<compile_context>
chip_gen: v6e
topology: v6e:2x2x1
jax: 0.10.0
libtpu: 0.0.40
codegen_flags: <defaults>
</compile_context>

<pallas_src>
import functools

import jax
import jax.numpy as jnp
from jax.experimental import pallas as pl
from jax.experimental.pallas import tpu as pltpu

LANE = 128  # TPU lane width; intermediate channel dims are padded up to a multiple of this.


def _round_up(v, m):
    return (v + m - 1) // m * m


# ----------------------------- Pallas kernels ----------------------------- #
# One grid step == one full output image (all Ho*Wo rows at once).

def _conv1_bypass_kernel(xph_ref, w_ref, y1_ref, byp_ref, s1_ref, q1_ref):
    """SN-Conv 4x4/s2/p1 (bias absorbed by BN1) + fused AvgPool2x2+SN-Conv1x1 bypass
    (bias folded into the final shift) + per-image BN1 batch moments (sum, sum-sq).

    xph_ref: (1, Hp/2, Wp/2, 4*Cin) bf16 -- padded input, 2x2 phases stacked in lanes.
    w_ref:   (4 * 4*Cin, Cp1+Cp2) bf16   -- conv1 and bypass weights column-stacked,
                                            grouped by 2x2 window shift (dh, dw).
    """
    _, hp2, wp2, c4 = xph_ref.shape
    _, ho, wo, cp1 = y1_ref.shape
    cp2 = byp_ref.shape[3]

    xv = xph_ref[0]  # (Hp/2, Wp/2, 4*Cin) bf16

    acc = jnp.zeros((ho * wo, cp1 + cp2), jnp.float32)
    for t, (dh, dw) in enumerate(((0, 0), (0, 1), (1, 0), (1, 1))):
        patch = xv[dh:dh + ho, dw:dw + wo, :].reshape(ho * wo, c4)
        acc = acc + jnp.dot(patch, w_ref[t * c4:(t + 1) * c4, :],
                            preferred_element_type=jnp.float32)

    acc1 = acc[:, :cp1]     # conv1 output (pre-BN1)
    accb = acc[:, cp1:]     # bypass output (pre-bias)

    y1_ref[...] = acc1.reshape(1, ho, wo, cp1).astype(y1_ref.dtype)
    byp_ref[...] = accb.reshape(1, ho, wo, cp2)
    s1_ref[...] = jnp.sum(acc1, axis=0).reshape(1, 1, cp1)
    q1_ref[...] = jnp.sum(acc1 * acc1, axis=0).reshape(1, 1, cp1)


def _bn1relu_conv2_kernel(y1_ref, s1_ref, t1_ref, w2_ref, y2_ref, s2_ref, q2_ref, apad):
    """BN1-apply + ReLU fused into the 3x3/s1/p1 conv2 (bias absorbed by BN2), plus BN2
    batch moments.  The zero-padded halo lives only in a bf16 VMEM scratch."""
    _, ho, wo, cp1 = y1_ref.shape
    cp2 = y2_ref.shape[3]

    a1 = jnp.maximum(y1_ref[0].astype(jnp.float32) * s1_ref[...] + t1_ref[...], 0.0)
    apad[...] = jnp.zeros_like(apad)
    apad[1:ho + 1, 1:wo + 1, :] = a1.astype(apad.dtype)

    acc = jnp.zeros((ho * wo, cp2), jnp.float32)
    for kh in range(3):
        for kw in range(3):
            t = kh * 3 + kw
            patch = apad[kh:kh + ho, kw:kw + wo, :].reshape(ho * wo, cp1)
            acc = acc + jnp.dot(patch, w2_ref[t * cp1:(t + 1) * cp1, :],
                                preferred_element_type=jnp.float32)

    y2_ref[...] = acc.reshape(1, ho, wo, cp2).astype(y2_ref.dtype)
    s2_ref[...] = jnp.sum(acc, axis=0).reshape(1, 1, cp2)
    q2_ref[...] = jnp.sum(acc * acc, axis=0).reshape(1, 1, cp2)


def _add_bn2_relu_kernel(byp_ref, y2_ref, s2_ref, t2_ref, o_ref):
    """out = ReLU(bypass + y2*scale2 + shift2'), shift2' = BN2 shift + b_bypass.
    The bypass buffer is aliased into the output (input_output_aliases)."""
    o_ref[...] = jnp.maximum(
        byp_ref[...] + y2_ref[...].astype(jnp.float32) * s2_ref[...] + t2_ref[...], 0.0)


# ------------------------------- JAX glue ---------------------------------- #

def spectral_normalize(w, n_iter=10):
    # TODO(synk): PyTorch's spectral_norm keeps persistent u/v buffers and does ONE power
    # iteration per forward; here we run a converged deterministic power iteration on the
    # fresh weight, so values differ slightly from the stateful PyTorch module.
    c_out = w.shape[0]
    mat = w.reshape(c_out, -1)
    u = jnp.ones((c_out,), jnp.float32)
    u = u / jnp.linalg.norm(u)
    v = None
    for _ in range(n_iter):
        v = mat.T @ u
        v = v / (jnp.linalg.norm(v) + 1e-12)
        u = mat @ v
        u = u / (jnp.linalg.norm(u) + 1e-12)
    sigma = u @ (mat @ v)
    return w / sigma


def _bn_scale_shift(ssum, ssq, count, gamma, beta, eps=1e-5):
    # train-mode BatchNorm2d: batch statistics, biased variance
    mean = ssum / count
    var = jnp.maximum(ssq / count - mean * mean, 0.0)
    scale = gamma * jax.lax.rsqrt(var + eps)
    shift = beta - mean * scale
    return scale, shift


# ------------------------------- forward ----------------------------------- #

def down_layer_residual_2d(x_nchw, params):
    n, c_in, h, w = x_nchw.shape
    assert h % 2 == 0 and w % 2 == 0
    c_out = params['w_bypass'].shape[0]
    ho, wo = h // 2, w // 2
    hp2, wp2 = (h + 2) // 2, (w + 2) // 2
    c4 = 4 * c_in
    cp1 = _round_up(c_in, LANE)    # conv1 output / conv2 input channels, lane-padded
    cp2 = _round_up(c_out, LANE)   # conv2 / bypass / module output channels, lane-padded

    # ---- weight prep ---------------------------------------------------------------------
    # conv1 (4x4): group taps by 2x2 window shift (dh,dw); within a shift the 4 phases
    # (ph_h, ph_w) live in the lane dim of the input -> rows = (ph_h*2+ph_w)*c_in + i.
    w1sn = spectral_normalize(params['w_conv1'])                      # (c_in, c_in, 4, 4)
    w1r = jnp.transpose(w1sn, (2, 3, 1, 0))                           # [kh, kw, i, o]
    w1r = w1r.reshape(2, 2, 2, 2, c_in, c_in)                         # [dh, ph_h, dw, ph_w, i, o]
    w1r = jnp.transpose(w1r, (0, 2, 1, 3, 4, 5)).reshape(4, c4, c_in)
    w1p = jnp.pad(w1r, ((0, 0), (0, 0), (0, cp1 - c_in)))             # (4, 4*c_in, cp1)

    # bypass: AvgPool2d(2,2)+1x1 conv == 2x2/stride-2 conv with weights w1x1/4; each window
    # shift (dh,dw) touches exactly one phase (1-dh, 1-dw).
    wbsn = spectral_normalize(params['w_bypass'])[:, :, 0, 0]         # (c_out, c_in)
    wb_t = wbsn.T / 4.0                                               # (c_in, c_out)
    wb_blocks = []
    for dh in range(2):
        for dw in range(2):
            blk = jnp.zeros((4, c_in, c_out), jnp.float32)
            blk = blk.at[(1 - dh) * 2 + (1 - dw)].set(wb_t)
            wb_blocks.append(blk.reshape(c4, c_out))
    wbr = jnp.stack(wb_blocks, axis=0)                                # (4, 4*c_in, c_out)
    wbp = jnp.pad(wbr, ((0, 0), (0, 0), (0, cp2 - c_out)))

    # conv1 and bypass weights column-stacked -> one accumulator per shift in kernel 1
    wcomb = jnp.concatenate([w1p, wbp], axis=-1)                      # (4, 4*c_in, cp1+cp2)
    wcomb = wcomb.reshape(4 * c4, cp1 + cp2).astype(jnp.bfloat16)

    w2sn = spectral_normalize(params['w_conv2'])                      # (c_out, c_in, 3, 3)
    w2m = jnp.transpose(w2sn, (2, 3, 1, 0))                           # (3,3,c_in,c_out)
    w2m = jnp.pad(w2m, ((0, 0), (0, 0), (0, cp1 - c_in), (0, cp2 - c_out)))
    w2m = w2m.reshape(9 * cp1, cp2).astype(jnp.bfloat16)

    g1 = jnp.pad(params['bn1_gamma'], (0, cp1 - c_in))
    b1 = jnp.pad(params['bn1_beta'], (0, cp1 - c_in))
    g2 = jnp.pad(params['bn2_gamma'], (0, cp2 - c_out))
    b2 = jnp.pad(params['bn2_beta'], (0, cp2 - c_out))
    bb = jnp.pad(params['b_bypass'], (0, cp2 - c_out))
    # b_conv1 / b_conv2 are dropped: a constant bias is absorbed exactly by the train-mode
    # BatchNorm that immediately follows each conv (mean shifts by the bias, variance unchanged).

    # ---- input prep: NCHW -> NHWC, spatial pad 1, phases stacked into the lane dim ---------
    x = jnp.transpose(x_nchw, (0, 2, 3, 1))
    xpad = jnp.pad(x, ((0, 0), (1, 1), (1, 1), (0, 0)))
    xph = xpad.reshape(n, hp2, 2, wp2, 2, c_in)
    xph = jnp.transpose(xph, (0, 1, 3, 2, 4, 5)).reshape(n, hp2, wp2, c4)
    xph = xph.astype(jnp.bfloat16)

    count = float(n * ho * wo)

    # ---- kernel 1: conv1(4x4/s2/p1) + bypass + BN1 moments -------------------------------
    flops1 = 2 * n * ho * wo * c4 * (cp1 + cp2)
    bytes1 = (xph.size * 2 + wcomb.size * 2
              + n * ho * wo * (2 * cp1 + 4 * cp2) + 2 * n * cp1 * 4)
    y1, byp, s1p, q1p = pl.pallas_call(
        _conv1_bypass_kernel,
        out_shape=(jax.ShapeDtypeStruct((n, ho, wo, cp1), jnp.bfloat16),
                   jax.ShapeDtypeStruct((n, ho, wo, cp2), jnp.float32),
                   jax.ShapeDtypeStruct((n, 1, cp1), jnp.float32),
                   jax.ShapeDtypeStruct((n, 1, cp1), jnp.float32)),
        grid=(n,),
        in_specs=[pl.BlockSpec((1, hp2, wp2, c4), lambda i: (i, 0, 0, 0)),
                  pl.BlockSpec((4 * c4, cp1 + cp2), lambda i: (0, 0))],
        out_specs=(pl.BlockSpec((1, ho, wo, cp1), lambda i: (i, 0, 0, 0)),
                   pl.BlockSpec((1, ho, wo, cp2), lambda i: (i, 0, 0, 0)),
                   pl.BlockSpec((1, 1, cp1), lambda i: (i, 0, 0)),
                   pl.BlockSpec((1, 1, cp1), lambda i: (i, 0, 0))),
        compiler_params=pltpu.CompilerParams(dimension_semantics=("parallel",)),
        cost_estimate=pl.CostEstimate(flops=flops1, transcendentals=0,
                                      bytes_accessed=bytes1),
    )(xph, wcomb)

    s1, t1 = _bn_scale_shift(jnp.sum(s1p, axis=0), jnp.sum(q1p, axis=0), count, g1, b1)
    s1 = s1.reshape(1, 1, cp1)
    t1 = t1.reshape(1, 1, cp1)

    # ---- kernel 2: BN1-apply + ReLU + conv2(3x3/s1/p1) + BN2 moments ---------------------
    flops2 = 2 * n * ho * wo * 9 * cp1 * cp2
    bytes2 = (n * ho * wo * cp1 * 2 + w2m.size * 2
              + n * ho * wo * cp2 * 2 + 2 * n * cp2 * 4)
    y2, s2p, q2p = pl.pallas_call(
        _bn1relu_conv2_kernel,
        out_shape=(jax.ShapeDtypeStruct((n, ho, wo, cp2), jnp.bfloat16),
                   jax.ShapeDtypeStruct((n, 1, cp2), jnp.float32),
                   jax.ShapeDtypeStruct((n, 1, cp2), jnp.float32)),
        grid=(n,),
        in_specs=[pl.BlockSpec((1, ho, wo, cp1), lambda i: (i, 0, 0, 0)),
                  pl.BlockSpec((1, 1, cp1), lambda i: (0, 0, 0)),
                  pl.BlockSpec((1, 1, cp1), lambda i: (0, 0, 0)),
                  pl.BlockSpec((9 * cp1, cp2), lambda i: (0, 0))],
        out_specs=(pl.BlockSpec((1, ho, wo, cp2), lambda i: (i, 0, 0, 0)),
                   pl.BlockSpec((1, 1, cp2), lambda i: (i, 0, 0)),
                   pl.BlockSpec((1, 1, cp2), lambda i: (i, 0, 0))),
        scratch_shapes=[pltpu.VMEM((ho + 2, wo + 2, cp1), jnp.bfloat16)],
        compiler_params=pltpu.CompilerParams(dimension_semantics=("parallel",)),
        cost_estimate=pl.CostEstimate(flops=flops2, transcendentals=0,
                                      bytes_accessed=bytes2),
    )(y1, s1, t1, w2m)

    s2, t2 = _bn_scale_shift(jnp.sum(s2p, axis=0), jnp.sum(q2p, axis=0), count, g2, b2)
    s2 = s2.reshape(1, 1, 1, cp2)
    t2 = (t2 + bb).reshape(1, 1, 1, cp2)      # fold the bypass conv bias into the final shift

    # ---- kernel 3: out = ReLU(bypass + BN2(resid)); bypass buffer aliased into out --------
    flops3 = 3 * n * ho * wo * cp2
    bytes3 = n * ho * wo * cp2 * (4 + 2 + 4)
    out_p = pl.pallas_call(
        _add_bn2_relu_kernel,
        out_shape=jax.ShapeDtypeStruct((n, ho, wo, cp2), jnp.float32),
        grid=(n,),
        in_specs=[pl.BlockSpec((1, ho, wo, cp2), lambda i: (i, 0, 0, 0)),
                  pl.BlockSpec((1, ho, wo, cp2), lambda i: (i, 0, 0, 0)),
                  pl.BlockSpec((1, 1, 1, cp2), lambda i: (0, 0, 0, 0)),
                  pl.BlockSpec((1, 1, 1, cp2), lambda i: (0, 0, 0, 0))],
        out_specs=pl.BlockSpec((1, ho, wo, cp2), lambda i: (i, 0, 0, 0)),
        input_output_aliases={0: 0},
        compiler_params=pltpu.CompilerParams(dimension_semantics=("parallel",)),
        cost_estimate=pl.CostEstimate(flops=flops3, transcendentals=0,
                                      bytes_accessed=bytes3),
    )(byp, y2, s2, t2)

    out = out_p[:, :, :, :c_out]
    return jnp.transpose(out, (0, 3, 1, 2))   # back to NCHW


# --------------------------- pure-JAX reference ----------------------------- #

def _bn_train_ref(y, gamma, beta, eps=1e-5):
    mean = jnp.mean(y, axis=(0, 2, 3), keepdims=True)
    var = jnp.var(y, axis=(0, 2, 3), keepdims=True)
    return ((y - mean) * jax.lax.rsqrt(var + eps) * gamma[None, :, None, None]
            + beta[None, :, None, None])


def _reference_forward(x_nchw, params):
    """Faithful XLA reference of the PyTorch module (biases included) for validation."""
    n, c, h, w = x_nchw.shape
    dn = ('NCHW', 'OIHW', 'NCHW')
    w1 = spectral_normalize(params['w_conv1'])
    w2 = spectral_normalize(params['w_conv2'])
    wb = spectral_normalize(params['w_bypass'])

    pooled = x_nchw.reshape(n, c, h // 2, 2, w // 2, 2).mean(axis=(3, 5))
    byp = jax.lax.conv_general_dilated(pooled, wb, (1, 1), 'VALID', dimension_numbers=dn)
    byp = byp + params['b_bypass'][None, :, None, None]

    y1 = jax.lax.conv_general_dilated(x_nchw, w1, (2, 2), ((1, 1), (1, 1)),
                                      dimension_numbers=dn)
    y1 = y1 + params['b_conv1'][None, :, None, None]
    a1 = jnp.maximum(_bn_train_ref(y1, params['bn1_gamma'], params['bn1_beta']), 0.0)
    y2 = jax.lax.conv_general_dilated(a1, w2, (1, 1), ((1, 1), (1, 1)),
                                      dimension_numbers=dn)
    y2 = y2 + params['b_conv2'][None, :, None, None]
    y2 = _bn_train_ref(y2, params['bn2_gamma'], params['bn2_beta'])
    return jnp.maximum(byp + y2, 0.0)


# ------------------------------- params ------------------------------------ #

def init_params(key, ch_in, ch_out):
    ks = jax.random.split(key, 6)

    def uinit(k, shape, fan_in):
        bound = 1.0 / jnp.sqrt(float(fan_in))
        return jax.random.uniform(k, shape, jnp.float32, -bound, bound)

    return {
        'w_bypass': uinit(ks[0], (ch_out, ch_in, 1, 1), ch_in),
        'b_bypass': uinit(ks[1], (ch_out,), ch_in),
        'w_conv1':  uinit(ks[2], (ch_in, ch_in, 4, 4), ch_in * 16),
        'b_conv1':  uinit(ks[3], (ch_in,), ch_in * 16),
        'w_conv2':  uinit(ks[4], (ch_out, ch_in, 3, 3), ch_in * 9),
        'b_conv2':  uinit(ks[5], (ch_out,), ch_in * 9),
        'bn1_gamma': jnp.ones((ch_in,), jnp.float32),
        'bn1_beta':  jnp.zeros((ch_in,), jnp.float32),
        'bn2_gamma': jnp.ones((ch_out,), jnp.float32),
        'bn2_beta':  jnp.zeros((ch_out,), jnp.float32),
    }


if __name__ == "__main__":
    key = jax.random.PRNGKey(0)
    k_x, k_p = jax.random.split(key)
    batch, ch_in, ch_out, hw = 2, 4, 8, 16
    x = jax.random.normal(k_x, (batch, ch_in, hw, hw), jnp.float32)
    params = init_params(k_p, ch_in, ch_out)

    fwd = jax.jit(functools.partial(down_layer_residual_2d, params=params))
    out = fwd(x)
    jax.block_until_ready(out)

    assert out.shape == (batch, ch_out, hw // 2, hw // 2), out.shape
    assert bool(jnp.all(out >= 0.0))  # final ReLU

    ref = _reference_forward(x, params)
    err = float(jnp.max(jnp.abs(out - ref)))
    assert err < 0.25, f"max |err| vs reference = {err}"  # bf16 matmul path, loose tolerance
    print("KERNEL_OK")
</pallas_src>

<mosaic_0001>
module attributes {stable_mosaic.version = 11 : i64} {
  func.func @_conv1_bypass_kernel(%arg0: i32, %arg1: memref<1x9x9x16xbf16, #tpu.memory_space<vmem>>, %arg2: memref<64x256xbf16, #tpu.memory_space<vmem>>, %arg3: memref<1x8x8x128xbf16, #tpu.memory_space<vmem>>, %arg4: memref<1x8x8x128xf32, #tpu.memory_space<vmem>>, %arg5: memref<1x1x128xf32, #tpu.memory_space<vmem>>, %arg6: memref<1x1x128xf32, #tpu.memory_space<vmem>>) attributes {dimension_semantics = [#tpu.dimension_semantics<parallel>], iteration_bounds = array<i64: 2>, scalar_prefetch = 0 : i64, scratch_operands = 0 : i64, tpu.core_type = #tpu.core_type<tc>, window_params = [{transform_indices = @transform_0, window_bounds = array<i64: 1, 9, 9, 16>}, {pipeline_mode = #tpu.pipeline_mode<synchronous>, transform_indices = @transform_1, window_bounds = array<i64: 64, 256>}, {transform_indices = @transform_2, window_bounds = array<i64: 1, 8, 8, 128>}, {transform_indices = @transform_3, window_bounds = array<i64: 1, 8, 8, 128>}, {transform_indices = @transform_4, window_bounds = array<i64: 1, 1, 128>}, {transform_indices = @transform_5, window_bounds = array<i64: 1, 1, 128>}]} {
    %c0 = arith.constant 0 : index
    %c0_0 = arith.constant 0 : index
    %c0_1 = arith.constant 0 : index
    %c0_2 = arith.constant 0 : index
    %0 = vector.load %arg1[%c0, %c0_0, %c0_1, %c0_2] : memref<1x9x9x16xbf16, #tpu.memory_space<vmem>>, vector<1x9x9x16xbf16>
    %1 = vector.shape_cast %0 : vector<1x9x9x16xbf16> to vector<9x9x16xbf16>
    %cst = arith.constant 0.000000e+00 : f32
    %2 = vector.broadcast %cst : f32 to vector<64x256xf32>
    %3 = vector.extract_strided_slice %1 {offsets = [0, 0, 0], sizes = [8, 8, 16], strides = [1, 1, 1]} : vector<9x9x16xbf16> to vector<8x8x16xbf16>
    %4 = vector.shape_cast %3 : vector<8x8x16xbf16> to vector<64x16xbf16>
    %c0_3 = arith.constant 0 : index
    %c0_4 = arith.constant 0 : index
    %5 = vector.load %arg2[%c0_3, %c0_4] : memref<64x256xbf16, #tpu.memory_space<vmem>>, vector<16x256xbf16>
    %cst_5 = arith.constant dense<0.000000e+00> : vector<64x256xf32>
    %6 = tpu.matmul %4, %5, %cst_5 {dimension_numbers = #tpu.dot_dimension_numbers<[1], [0], [0], [1], [0, 0, 1, 1], [], []>} : vector<64x16xbf16>, vector<16x256xbf16>, vector<64x256xf32> -> vector<64x256xf32>
    %7 = arith.addf %2, %6 : vector<64x256xf32>
    %8 = vector.extract_strided_slice %1 {offsets = [0, 1, 0], sizes = [8, 8, 16], strides = [1, 1, 1]} : vector<9x9x16xbf16> to vector<8x8x16xbf16>
    %9 = vector.shape_cast %8 : vector<8x8x16xbf16> to vector<64x16xbf16>
    %c16 = arith.constant 16 : index
    %c0_6 = arith.constant 0 : index
    %10 = vector.load %arg2[%c16, %c0_6] : memref<64x256xbf16, #tpu.memory_space<vmem>>, vector<16x256xbf16>
    %cst_7 = arith.constant dense<0.000000e+00> : vector<64x256xf32>
    %11 = tpu.matmul %9, %10, %cst_7 {dimension_numbers = #tpu.dot_dimension_numbers<[1], [0], [0], [1], [0, 0, 1, 1], [], []>} : vector<64x16xbf16>, vector<16x256xbf16>, vector<64x256xf32> -> vector<64x256xf32>
    %12 = arith.addf %7, %11 : vector<64x256xf32>
    %13 = vector.extract_strided_slice %1 {offsets = [1, 0, 0], sizes = [8, 8, 16], strides = [1, 1, 1]} : vector<9x9x16xbf16> to vector<8x8x16xbf16>
    %14 = vector.shape_cast %13 : vector<8x8x16xbf16> to vector<64x16xbf16>
    %c32 = arith.constant 32 : index
    %c0_8 = arith.constant 0 : index
    %15 = vector.load %arg2[%c32, %c0_8] : memref<64x256xbf16, #tpu.memory_space<vmem>>, vector<16x256xbf16>
    %cst_9 = arith.constant dense<0.000000e+00> : vector<64x256xf32>
    %16 = tpu.matmul %14, %15, %cst_9 {dimension_numbers = #tpu.dot_dimension_numbers<[1], [0], [0], [1], [0, 0, 1, 1], [], []>} : vector<64x16xbf16>, vector<16x256xbf16>, vector<64x256xf32> -> vector<64x256xf32>
    %17 = arith.addf %12, %16 : vector<64x256xf32>
    %18 = vector.extract_strided_slice %1 {offsets = [1, 1, 0], sizes = [8, 8, 16], strides = [1, 1, 1]} : vector<9x9x16xbf16> to vector<8x8x16xbf16>
    %19 = vector.shape_cast %18 : vector<8x8x16xbf16> to vector<64x16xbf16>
    %c48 = arith.constant 48 : index
    %c0_10 = arith.constant 0 : index
    %20 = vector.load %arg2[%c48, %c0_10] : memref<64x256xbf16, #tpu.memory_space<vmem>>, vector<16x256xbf16>
    %cst_11 = arith.constant dense<0.000000e+00> : vector<64x256xf32>
    %21 = tpu.matmul %19, %20, %cst_11 {dimension_numbers = #tpu.dot_dimension_numbers<[1], [0], [0], [1], [0, 0, 1, 1], [], []>} : vector<64x16xbf16>, vector<16x256xbf16>, vector<64x256xf32> -> vector<64x256xf32>
    %22 = arith.addf %17, %21 : vector<64x256xf32>
    %23 = vector.extract_strided_slice %22 {offsets = [0, 0], sizes = [64, 128], strides = [1, 1]} : vector<64x256xf32> to vector<64x128xf32>
    %24 = vector.extract_strided_slice %22 {offsets = [0, 128], sizes = [64, 128], strides = [1, 1]} : vector<64x256xf32> to vector<64x128xf32>
    %25 = vector.shape_cast %23 : vector<64x128xf32> to vector<1x8x8x128xf32>
    %26 = arith.truncf %25 : vector<1x8x8x128xf32> to vector<1x8x8x128xbf16>
    %c0_12 = arith.constant 0 : index
    %c0_13 = arith.constant 0 : index
    %c0_14 = arith.constant 0 : index
    %c0_15 = arith.constant 0 : index
    %27 = vector.load %arg3[%c0_12, %c0_13, %c0_14, %c0_15] : memref<1x8x8x128xbf16, #tpu.memory_space<vmem>>, vector<1x8x8x128xbf16>
    tpu.vector_store %arg3[%c0_12, %c0_13, %c0_14, %c0_15], %26 {strides = array<i32>} : memref<1x8x8x128xbf16, #tpu.memory_space<vmem>>, vector<1x8x8x128xbf16>,
    %28 = vector.shape_cast %24 : vector<64x128xf32> to vector<1x8x8x128xf32>
    %c0_16 = arith.constant 0 : index
    %c0_17 = arith.constant 0 : index
    %c0_18 = arith.constant 0 : index
    %c0_19 = arith.constant 0 : index
    %29 = vector.load %arg4[%c0_16, %c0_17, %c0_18, %c0_19] : memref<1x8x8x128xf32, #tpu.memory_space<vmem>>, vector<1x8x8x128xf32>
    tpu.vector_store %arg4[%c0_16, %c0_17, %c0_18, %c0_19], %28 {strides = array<i32>} : memref<1x8x8x128xf32, #tpu.memory_space<vmem>>, vector<1x8x8x128xf32>,
    %cst_20 = arith.constant dense<0.000000e+00> : vector<128xf32>
    %30 = vector.multi_reduction <add>, %23, %cst_20 [0] : vector<64x128xf32> to vector<128xf32>
    %31 = vector.shape_cast %30 : vector<128xf32> to vector<1x1x128xf32>
    %c0_21 = arith.constant 0 : index
    %c0_22 = arith.constant 0 : index
    %c0_23 = arith.constant 0 : index
    %32 = vector.load %arg5[%c0_21, %c0_22, %c0_23] : memref<1x1x128xf32, #tpu.memory_space<vmem>>, vector<1x1x128xf32>
    tpu.vector_store %arg5[%c0_21, %c0_22, %c0_23], %31 {strides = array<i32>} : memref<1x1x128xf32, #tpu.memory_space<vmem>>, vector<1x1x128xf32>,
    %33 = arith.mulf %23, %23 : vector<64x128xf32>
    %cst_24 = arith.constant dense<0.000000e+00> : vector<128xf32>
    %34 = vector.multi_reduction <add>, %33, %cst_24 [0] : vector<64x128xf32> to vector<128xf32>
    %35 = vector.shape_cast %34 : vector<128xf32> to vector<1x1x128xf32>
    %c0_25 = arith.constant 0 : index
    %c0_26 = arith.constant 0 : index
    %c0_27 = arith.constant 0 : index
    %36 = vector.load %arg6[%c0_25, %c0_26, %c0_27] : memref<1x1x128xf32, #tpu.memory_space<vmem>>, vector<1x1x128xf32>
    tpu.vector_store %arg6[%c0_25, %c0_26, %c0_27], %35 {strides = array<i32>} : memref<1x1x128xf32, #tpu.memory_space<vmem>>, vector<1x1x128xf32>,
    return
  }
  func.func @transform_0(%arg0: i32) -> (i32, i32, i32, i32) {
    %c0_i32 = arith.constant 0 : i32
    %c0_i32_0 = arith.constant 0 : i32
    %c0_i32_1 = arith.constant 0 : i32
    %c0_i32_2 = arith.constant 0 : i32
    return %arg0, %c0_i32, %c0_i32_0, %c0_i32_1 : i32, i32, i32, i32
  }
  func.func @transform_1(%arg0: i32) -> (i32, i32) {
    %c0_i32 = arith.constant 0 : i32
    %c0_i32_0 = arith.constant 0 : i32
    %c0_i32_1 = arith.constant 0 : i32
    return %c0_i32, %c0_i32_0 : i32, i32
  }
  func.func @transform_2(%arg0: i32) -> (i32, i32, i32, i32) {
    %c0_i32 = arith.constant 0 : i32
    %c0_i32_0 = arith.constant 0 : i32
    %c0_i32_1 = arith.constant 0 : i32
    %c0_i32_2 = arith.constant 0 : i32
    return %arg0, %c0_i32, %c0_i32_0, %c0_i32_1 : i32, i32, i32, i32
  }
  func.func @transform_3(%arg0: i32) -> (i32, i32, i32, i32) {
    %c0_i32 = arith.constant 0 : i32
    %c0_i32_0 = arith.constant 0 : i32
    %c0_i32_1 = arith.constant 0 : i32
    %c0_i32_2 = arith.constant 0 : i32
    return %arg0, %c0_i32, %c0_i32_0, %c0_i32_1 : i32, i32, i32, i32
  }
  func.func @transform_4(%arg0: i32) -> (i32, i32, i32) {
    %c0_i32 = arith.constant 0 : i32
    %c0_i32_0 = arith.constant 0 : i32
    %c0_i32_1 = arith.constant 0 : i32
    return %arg0, %c0_i32, %c0_i32_0 : i32, i32, i32
  }
  func.func @transform_5(%arg0: i32) -> (i32, i32, i32) {
    %c0_i32 = arith.constant 0 : i32
    %c0_i32_0 = arith.constant 0 : i32
    %c0_i32_1 = arith.constant 0 : i32
    return %arg0, %c0_i32, %c0_i32_0 : i32, i32, i32
  }
}

module attributes {stable_mosaic.version = 11 : i64} {
  func.func @_bn1relu_conv2_kernel(%arg0: i32, %arg1: memref<1x8x8x128xbf16, #tpu.memory_space<vmem>>, %arg2: memref<1x1x128xf32, #tpu.memory_space<vmem>>, %arg3: memref<1x1x128xf32, #tpu.memory_space<vmem>>, %arg4: memref<1152x128xbf16, #tpu.memory_space<vmem>>, %arg5: memref<1x8x8x128xbf16, #tpu.memory_space<vmem>>, %arg6: memref<1x1x128xf32, #tpu.memory_space<vmem>>, %arg7: memref<1x1x128xf32, #tpu.memory_space<vmem>>, %arg8: memref<10x10x128xbf16, #tpu.memory_space<vmem>>) attributes {dimension_semantics = [#tpu.dimension_semantics<parallel>], iteration_bounds = array<i64: 2>, scalar_prefetch = 0 : i64, scratch_operands = 1 : i64, tpu.core_type = #tpu.core_type<tc>, window_params = [{transform_indices = @transform_0, window_bounds = array<i64: 1, 8, 8, 128>}, {pipeline_mode = #tpu.pipeline_mode<synchronous>, transform_indices = @transform_1, window_bounds = array<i64: 1, 1, 128>}, {pipeline_mode = #tpu.pipeline_mode<synchronous>, transform_indices = @transform_2, window_bounds = array<i64: 1, 1, 128>}, {pipeline_mode = #tpu.pipeline_mode<synchronous>, transform_indices = @transform_3, window_bounds = array<i64: 1152, 128>}, {transform_indices = @transform_4, window_bounds = array<i64: 1, 8, 8, 128>}, {transform_indices = @transform_5, window_bounds = array<i64: 1, 1, 128>}, {transform_indices = @transform_6, window_bounds = array<i64: 1, 1, 128>}]} {
    %c0 = arith.constant 0 : index
    %c0_0 = arith.constant 0 : index
    %c0_1 = arith.constant 0 : index
    %c0_2 = arith.constant 0 : index
    %0 = vector.load %arg1[%c0, %c0_0, %c0_1, %c0_2] : memref<1x8x8x128xbf16, #tpu.memory_space<vmem>>, vector<1x8x8x128xbf16>
    %1 = vector.shape_cast %0 : vector<1x8x8x128xbf16> to vector<8x8x128xbf16>
    %2 = arith.extf %1 : vector<8x8x128xbf16> to vector<8x8x128xf32>
    %c0_3 = arith.constant 0 : index
    %c0_4 = arith.constant 0 : index
    %c0_5 = arith.constant 0 : index
    %3 = vector.load %arg2[%c0_3, %c0_4, %c0_5] : memref<1x1x128xf32, #tpu.memory_space<vmem>>, vector<1x1x128xf32>
    %4 = vector.broadcast %3 : vector<1x1x128xf32> to vector<8x8x128xf32>
    %5 = arith.mulf %2, %4 : vector<8x8x128xf32>
    %c0_6 = arith.constant 0 : index
    %c0_7 = arith.constant 0 : index
    %c0_8 = arith.constant 0 : index
    %6 = vector.load %arg3[%c0_6, %c0_7, %c0_8] : memref<1x1x128xf32, #tpu.memory_space<vmem>>, vector<1x1x128xf32>
    %7 = vector.broadcast %6 : vector<1x1x128xf32> to vector<8x8x128xf32>
    %8 = arith.addf %5, %7 : vector<8x8x128xf32>
    %cst = arith.constant 0.000000e+00 : f32
    %9 = vector.broadcast %cst : f32 to vector<8x8x128xf32>
    %10 = arith.maximumf %8, %9 : vector<8x8x128xf32>
    %cst_9 = arith.constant 0.000000e+00 : bf16
    %11 = vector.broadcast %cst_9 : bf16 to vector<10x10x128xbf16>
    %c0_10 = arith.constant 0 : index
    %c0_11 = arith.constant 0 : index
    %c0_12 = arith.constant 0 : index
    %12 = vector.load %arg8[%c0_10, %c0_11, %c0_12] : memref<10x10x128xbf16, #tpu.memory_space<vmem>>, vector<10x10x128xbf16>
    tpu.vector_store %arg8[%c0_10, %c0_11, %c0_12], %11 {strides = array<i32>} : memref<10x10x128xbf16, #tpu.memory_space<vmem>>, vector<10x10x128xbf16>,
    %13 = arith.truncf %10 : vector<8x8x128xf32> to vector<8x8x128xbf16>
    %c1 = arith.constant 1 : index
    %c1_13 = arith.constant 1 : index
    %c0_14 = arith.constant 0 : index
    %14 = vector.load %arg8[%c1, %c1_13, %c0_14] : memref<10x10x128xbf16, #tpu.memory_space<vmem>>, vector<8x8x128xbf16>
    tpu.vector_store %arg8[%c1, %c1_13, %c0_14], %13 {strides = array<i32>} : memref<10x10x128xbf16, #tpu.memory_space<vmem>>, vector<8x8x128xbf16>,
    %cst_15 = arith.constant 0.000000e+00 : f32
    %15 = vector.broadcast %cst_15 : f32 to vector<64x128xf32>
    %c0_16 = arith.constant 0 : index
    %c0_17 = arith.constant 0 : index
    %c0_18 = arith.constant 0 : index
    %16 = vector.load %arg8[%c0_16, %c0_17, %c0_18] : memref<10x10x128xbf16, #tpu.memory_space<vmem>>, vector<8x8x128xbf16>
    %17 = vector.shape_cast %16 : vector<8x8x128xbf16> to vector<64x128xbf16>
    %c0_19 = arith.constant 0 : index
    %c0_20 = arith.constant 0 : index
    %18 = vector.load %arg4[%c0_19, %c0_20] : memref<1152x128xbf16, #tpu.memory_space<vmem>>, vector<128x128xbf16>
    %cst_21 = arith.constant dense<0.000000e+00> : vector<64x128xf32>
    %19 = tpu.matmul %17, %18, %cst_21 {dimension_numbers = #tpu.dot_dimension_numbers<[1], [0], [0], [1], [0, 0, 1, 1], [], []>} : vector<64x128xbf16>, vector<128x128xbf16>, vector<64x128xf32> -> vector<64x128xf32>
    %20 = arith.addf %15, %19 : vector<64x128xf32>
    %c0_22 = arith.constant 0 : index
    %c1_23 = arith.constant 1 : index
    %c0_24 = arith.constant 0 : index
    %21 = vector.load %arg8[%c0_22, %c1_23, %c0_24] : memref<10x10x128xbf16, #tpu.memory_space<vmem>>, vector<8x8x128xbf16>
    %22 = vector.shape_cast %21 : vector<8x8x128xbf16> to vector<64x128xbf16>
    %c128 = arith.constant 128 : index
    %c0_25 = arith.constant 0 : index
    %23 = vector.load %arg4[%c128, %c0_25] : memref<1152x128xbf16, #tpu.memory_space<vmem>>, vector<128x128xbf16>
    %cst_26 = arith.constant dense<0.000000e+00> : vector<64x128xf32>
    %24 = tpu.matmul %22, %23, %cst_26 {dimension_numbers = #tpu.dot_dimension_numbers<[1], [0], [0], [1], [0, 0, 1, 1], [], []>} : vector<64x128xbf16>, vector<128x128xbf16>, vector<64x128xf32> -> vector<64x128xf32>
    %25 = arith.addf %20, %24 : vector<64x128xf32>
    %c0_27 = arith.constant 0 : index
    %c2 = arith.constant 2 : index
    %c0_28 = arith.constant 0 : index
    %26 = vector.load %arg8[%c0_27, %c2, %c0_28] : memref<10x10x128xbf16, #tpu.memory_space<vmem>>, vector<8x8x128xbf16>
    %27 = vector.shape_cast %26 : vector<8x8x128xbf16> to vector<64x128xbf16>
    %c256 = arith.constant 256 : index
    %c0_29 = arith.constant 0 : index
    %28 = vector.load %arg4[%c256, %c0_29] : memref<1152x128xbf16, #tpu.memory_space<vmem>>, vector<128x128xbf16>
    %cst_30 = arith.constant dense<0.000000e+00> : vector<64x128xf32>
    %29 = tpu.matmul %27, %28, %cst_30 {dimension_numbers = #tpu.dot_dimension_numbers<[1], [0], [0], [1], [0, 0, 1, 1], [], []>} : vector<64x128xbf16>, vector<128x128xbf16>, vector<64x128xf32> -> vector<64x128xf32>
    %30 = arith.addf %25, %29 : vector<64x128xf32>
    %c1_31 = arith.constant 1 : index
    %c0_32 = arith.constant 0 : index
    %c0_33 = arith.constant 0 : index
    %31 = vector.load %arg8[%c1_31, %c0_32, %c0_33] : memref<10x10x128xbf16, #tpu.memory_space<vmem>>, vector<8x8x128xbf16>
    %32 = vector.shape_cast %31 : vector<8x8x128xbf16> to vector<64x128xbf16>
    %c384 = arith.constant 384 : index
    %c0_34 = arith.constant 0 : index
    %33 = vector.load %arg4[%c384, %c0_34] : memref<1152x128xbf16, #tpu.memory_space<vmem>>, vector<128x128xbf16>
    %cst_35 = arith.constant dense<0.000000e+00> : vector<64x128xf32>
    %34 = tpu.matmul %32, %33, %cst_35 {dimension_numbers = #tpu.dot_dimension_numbers<[1], [0], [0], [1], [0, 0, 1, 1], [], []>} : vector<64x128xbf16>, vector<128x128xbf16>, vector<64x128xf32> -> vector<64x128xf32>
    %35 = arith.addf %30, %34 : vector<64x128xf32>
    %c1_36 = arith.constant 1 : index
    %c1_37 = arith.constant 1 : index
    %c0_38 = arith.constant 0 : index
    %36 = vector.load %arg8[%c1_36, %c1_37, %c0_38] : memref<10x10x128xbf16, #tpu.memory_space<vmem>>, vector<8x8x128xbf16>
    %37 = vector.shape_cast %36 : vector<8x8x128xbf16> to vector<64x128xbf16>
    %c512 = arith.constant 512 : index
    %c0_39 = arith.constant 0 : index
    %38 = vector.load %arg4[%c512, %c0_39] : memref<1152x128xbf16, #tpu.memory_space<vmem>>, vector<128x128xbf16>
    %cst_40 = arith.constant dense<0.000000e+00> : vector<64x128xf32>
    %39 = tpu.matmul %37, %38, %cst_40 {dimension_numbers = #tpu.dot_dimension_numbers<[1], [0], [0], [1], [0, 0, 1, 1], [], []>} : vector<64x128xbf16>, vector<128x128xbf16>, vector<64x128xf32> -> vector<64x128xf32>
    %40 = arith.addf %35, %39 : vector<64x128xf32>
    %c1_41 = arith.constant 1 : index
    %c2_42 = arith.constant 2 : index
    %c0_43 = arith.constant 0 : index
    %41 = vector.load %arg8[%c1_41, %c2_42, %c0_43] : memref<10x10x128xbf16, #tpu.memory_space<vmem>>, vector<8x8x128xbf16>
    %42 = vector.shape_cast %41 : vector<8x8x128xbf16> to vector<64x128xbf16>
    %c640 = arith.constant 640 : index
    %c0_44 = arith.constant 0 : index
    %43 = vector.load %arg4[%c640, %c0_44] : memref<1152x128xbf16, #tpu.memory_space<vmem>>, vector<128x128xbf16>
    %cst_45 = arith.constant dense<0.000000e+00> : vector<64x128xf32>
    %44 = tpu.matmul %42, %43, %cst_45 {dimension_numbers = #tpu.dot_dimension_numbers<[1], [0], [0], [1], [0, 0, 1, 1], [], []>} : vector<64x128xbf16>, vector<128x128xbf16>, vector<64x128xf32> -> vector<64x128xf32>
    %45 = arith.addf %40, %44 : vector<64x128xf32>
    %c2_46 = arith.constant 2 : index
    %c0_47 = arith.constant 0 : index
    %c0_48 = arith.constant 0 : index
    %46 = vector.load %arg8[%c2_46, %c0_47, %c0_48] : memref<10x10x128xbf16, #tpu.memory_space<vmem>>, vector<8x8x128xbf16>
    %47 = vector.shape_cast %46 : vector<8x8x128xbf16> to vector<64x128xbf16>
    %c768 = arith.constant 768 : index
    %c0_49 = arith.constant 0 : index
    %48 = vector.load %arg4[%c768, %c0_49] : memref<1152x128xbf16, #tpu.memory_space<vmem>>, vector<128x128xbf16>
    %cst_50 = arith.constant dense<0.000000e+00> : vector<64x128xf32>
    %49 = tpu.matmul %47, %48, %cst_50 {dimension_numbers = #tpu.dot_dimension_numbers<[1], [0], [0], [1], [0, 0, 1, 1], [], []>} : vector<64x128xbf16>, vector<128x128xbf16>, vector<64x128xf32> -> vector<64x128xf32>
    %50 = arith.addf %45, %49 : vector<64x128xf32>
    %c2_51 = arith.constant 2 : index
    %c1_52 = arith.constant 1 : index
    %c0_53 = arith.constant 0 : index
    %51 = vector.load %arg8[%c2_51, %c1_52, %c0_53] : memref<10x10x128xbf16, #tpu.memory_space<vmem>>, vector<8x8x128xbf16>
    %52 = vector.shape_cast %51 : vector<8x8x128xbf16> to vector<64x128xbf16>
    %c896 = arith.constant 896 : index
    %c0_54 = arith.constant 0 : index
    %53 = vector.load %arg4[%c896, %c0_54] : memref<1152x128xbf16, #tpu.memory_space<vmem>>, vector<128x128xbf16>
    %cst_55 = arith.constant dense<0.000000e+00> : vector<64x128xf32>
    %54 = tpu.matmul %52, %53, %cst_55 {dimension_numbers = #tpu.dot_dimension_numbers<[1], [0], [0], [1], [0, 0, 1, 1], [], []>} : vector<64x128xbf16>, vector<128x128xbf16>, vector<64x128xf32> -> vector<64x128xf32>
    %55 = arith.addf %50, %54 : vector<64x128xf32>
    %c2_56 = arith.constant 2 : index
    %c2_57 = arith.constant 2 : index
    %c0_58 = arith.constant 0 : index
    %56 = vector.load %arg8[%c2_56, %c2_57, %c0_58] : memref<10x10x128xbf16, #tpu.memory_space<vmem>>, vector<8x8x128xbf16>
    %57 = vector.shape_cast %56 : vector<8x8x128xbf16> to vector<64x128xbf16>
    %c1024 = arith.constant 1024 : index
    %c0_59 = arith.constant 0 : index
    %58 = vector.load %arg4[%c1024, %c0_59] : memref<1152x128xbf16, #tpu.memory_space<vmem>>, vector<128x128xbf16>
    %cst_60 = arith.constant dense<0.000000e+00> : vector<64x128xf32>
    %59 = tpu.matmul %57, %58, %cst_60 {dimension_numbers = #tpu.dot_dimension_numbers<[1], [0], [0], [1], [0, 0, 1, 1], [], []>} : vector<64x128xbf16>, vector<128x128xbf16>, vector<64x128xf32> -> vector<64x128xf32>
    %60 = arith.addf %55, %59 : vector<64x128xf32>
    %61 = vector.shape_cast %60 : vector<64x128xf32> to vector<1x8x8x128xf32>
    %62 = arith.truncf %61 : vector<1x8x8x128xf32> to vector<1x8x8x128xbf16>
    %c0_61 = arith.constant 0 : index
    %c0_62 = arith.constant 0 : index
    %c0_63 = arith.constant 0 : index
    %c0_64 = arith.constant 0 : index
    %63 = vector.load %arg5[%c0_61, %c0_62, %c0_63, %c0_64] : memref<1x8x8x128xbf16, #tpu.memory_space<vmem>>, vector<1x8x8x128xbf16>
    tpu.vector_store %arg5[%c0_61, %c0_62, %c0_63, %c0_64], %62 {strides = array<i32>} : memref<1x8x8x128xbf16, #tpu.memory_space<vmem>>, vector<1x8x8x128xbf16>,
    %cst_65 = arith.constant dense<0.000000e+00> : vector<128xf32>
    %64 = vector.multi_reduction <add>, %60, %cst_65 [0] : vector<64x128xf32> to vector<128xf32>
    %65 = vector.shape_cast %64 : vector<128xf32> to vector<1x1x128xf32>
    %c0_66 = arith.constant 0 : index
    %c0_67 = arith.constant 0 : index
    %c0_68 = arith.constant 0 : index
    %66 = vector.load %arg6[%c0_66, %c0_67, %c0_68] : memref<1x1x128xf32, #tpu.memory_space<vmem>>, vector<1x1x128xf32>
    tpu.vector_store %arg6[%c0_66, %c0_67, %c0_68], %65 {strides = array<i32>} : memref<1x1x128xf32, #tpu.memory_space<vmem>>, vector<1x1x128xf32>,
    %67 = arith.mulf %60, %60 : vector<64x128xf32>
    %cst_69 = arith.constant dense<0.000000e+00> : vector<128xf32>
    %68 = vector.multi_reduction <add>, %67, %cst_69 [0] : vector<64x128xf32> to vector<128xf32>
    %69 = vector.shape_cast %68 : vector<128xf32> to vector<1x1x128xf32>
    %c0_70 = arith.constant 0 : index
    %c0_71 = arith.constant 0 : index
    %c0_72 = arith.constant 0 : index
    %70 = vector.load %arg7[%c0_70, %c0_71, %c0_72] : memref<1x1x128xf32, #tpu.memory_space<vmem>>, vector<1x1x128xf32>
    tpu.vector_store %arg7[%c0_70, %c0_71, %c0_72], %69 {strides = array<i32>} : memref<1x1x128xf32, #tpu.memory_space<vmem>>, vector<1x1x128xf32>,
    return
  }
  func.func @transform_0(%arg0: i32) -> (i32, i32, i32, i32) {
    %c0_i32 = arith.constant 0 : i32
    %c0_i32_0 = arith.constant 0 : i32
    %c0_i32_1 = arith.constant 0 : i32
    %c0_i32_2 = arith.constant 0 : i32
    return %arg0, %c0_i32, %c0_i32_0, %c0_i32_1 : i32, i32, i32, i32
  }
  func.func @transform_1(%arg0: i32) -> (i32, i32, i32) {
    %c0_i32 = arith.constant 0 : i32
    %c0_i32_0 = arith.constant 0 : i32
    %c0_i32_1 = arith.constant 0 : i32
    %c0_i32_2 = arith.constant 0 : i32
    return %c0_i32, %c0_i32_0, %c0_i32_1 : i32, i32, i32
  }
  func.func @transform_2(%arg0: i32) -> (i32, i32, i32) {
    %c0_i32 = arith.constant 0 : i32
    %c0_i32_0 = arith.constant 0 : i32
    %c0_i32_1 = arith.constant 0 : i32
    %c0_i32_2 = arith.constant 0 : i32
    return %c0_i32, %c0_i32_0, %c0_i32_1 : i32, i32, i32
  }
  func.func @transform_3(%arg0: i32) -> (i32, i32) {
    %c0_i32 = arith.constant 0 : i32
    %c0_i32_0 = arith.constant 0 : i32
    %c0_i32_1 = arith.constant 0 : i32
    return %c0_i32, %c0_i32_0 : i32, i32
  }
  func.func @transform_4(%arg0: i32) -> (i32, i32, i32, i32) {
    %c0_i32 = arith.constant 0 : i32
    %c0_i32_0 = arith.constant 0 : i32
    %c0_i32_1 = arith.constant 0 : i32
    %c0_i32_2 = arith.constant 0 : i32
    return %arg0, %c0_i32, %c0_i32_0, %c0_i32_1 : i32, i32, i32, i32
  }
  func.func @transform_5(%arg0: i32) -> (i32, i32, i32) {
    %c0_i32 = arith.constant 0 : i32
    %c0_i32_0 = arith.constant 0 : i32
    %c0_i32_1 = arith.constant 0 : i32
    return %arg0, %c0_i32, %c0_i32_0 : i32, i32, i32
  }
  func.func @transform_6(%arg0: i32) -> (i32, i32, i32) {
    %c0_i32 = arith.constant 0 : i32
    %c0_i32_0 = arith.constant 0 : i32
    %c0_i32_1 = arith.constant 0 : i32
    return %arg0, %c0_i32, %c0_i32_0 : i32, i32, i32
  }
}

module attributes {stable_mosaic.version = 11 : i64} {
  func.func @_add_bn2_relu_kernel(%arg0: i32, %arg1: memref<1x8x8x128xf32, #tpu.memory_space<vmem>>, %arg2: memref<1x8x8x128xbf16, #tpu.memory_space<vmem>>, %arg3: memref<1x1x1x128xf32, #tpu.memory_space<vmem>>, %arg4: memref<1x1x1x128xf32, #tpu.memory_space<vmem>>, %arg5: memref<1x8x8x128xf32, #tpu.memory_space<vmem>>) attributes {dimension_semantics = [#tpu.dimension_semantics<parallel>], iteration_bounds = array<i64: 2>, scalar_prefetch = 0 : i64, scratch_operands = 0 : i64, tpu.core_type = #tpu.core_type<tc>, window_params = [{transform_indices = @transform_0, window_bounds = array<i64: 1, 8, 8, 128>}, {transform_indices = @transform_1, window_bounds = array<i64: 1, 8, 8, 128>}, {pipeline_mode = #tpu.pipeline_mode<synchronous>, transform_indices = @transform_2, window_bounds = array<i64: 1, 1, 1, 128>}, {pipeline_mode = #tpu.pipeline_mode<synchronous>, transform_indices = @transform_3, window_bounds = array<i64: 1, 1, 1, 128>}, {transform_indices = @transform_4, window_bounds = array<i64: 1, 8, 8, 128>}]} {
    %c0 = arith.constant 0 : index
    %c0_0 = arith.constant 0 : index
    %c0_1 = arith.constant 0 : index
    %c0_2 = arith.constant 0 : index
    %0 = vector.load %arg1[%c0, %c0_0, %c0_1, %c0_2] : memref<1x8x8x128xf32, #tpu.memory_space<vmem>>, vector<1x8x8x128xf32>
    %c0_3 = arith.constant 0 : index
    %c0_4 = arith.constant 0 : index
    %c0_5 = arith.constant 0 : index
    %c0_6 = arith.constant 0 : index
    %1 = vector.load %arg2[%c0_3, %c0_4, %c0_5, %c0_6] : memref<1x8x8x128xbf16, #tpu.memory_space<vmem>>, vector<1x8x8x128xbf16>
    %2 = arith.extf %1 : vector<1x8x8x128xbf16> to vector<1x8x8x128xf32>
    %c0_7 = arith.constant 0 : index
    %c0_8 = arith.constant 0 : index
    %c0_9 = arith.constant 0 : index
    %c0_10 = arith.constant 0 : index
    %3 = vector.load %arg3[%c0_7, %c0_8, %c0_9, %c0_10] : memref<1x1x1x128xf32, #tpu.memory_space<vmem>>, vector<1x1x1x128xf32>
    %4 = vector.broadcast %3 : vector<1x1x1x128xf32> to vector<1x8x8x128xf32>
    %5 = arith.mulf %2, %4 : vector<1x8x8x128xf32>
    %6 = arith.addf %0, %5 : vector<1x8x8x128xf32>
    %c0_11 = arith.constant 0 : index
    %c0_12 = arith.constant 0 : index
    %c0_13 = arith.constant 0 : index
    %c0_14 = arith.constant 0 : index
    %7 = vector.load %arg4[%c0_11, %c0_12, %c0_13, %c0_14] : memref<1x1x1x128xf32, #tpu.memory_space<vmem>>, vector<1x1x1x128xf32>
    %8 = vector.broadcast %7 : vector<1x1x1x128xf32> to vector<1x8x8x128xf32>
    %9 = arith.addf %6, %8 : vector<1x8x8x128xf32>
    %cst = arith.constant 0.000000e+00 : f32
    %10 = vector.broadcast %cst : f32 to vector<1x8x8x128xf32>
    %11 = arith.maximumf %9, %10 : vector<1x8x8x128xf32>
    %c0_15 = arith.constant 0 : index
    %c0_16 = arith.constant 0 : index
    %c0_17 = arith.constant 0 : index
    %c0_18 = arith.constant 0 : index
    %12 = vector.load %arg5[%c0_15, %c0_16, %c0_17, %c0_18] : memref<1x8x8x128xf32, #tpu.memory_space<vmem>>, vector<1x8x8x128xf32>
    tpu.vector_store %arg5[%c0_15, %c0_16, %c0_17, %c0_18], %11 {strides = array<i32>} : memref<1x8x8x128xf32, #tpu.memory_space<vmem>>, vector<1x8x8x128xf32>,
    return
  }
  func.func @transform_0(%arg0: i32) -> (i32, i32, i32, i32) {
    %c0_i32 = arith.constant 0 : i32
    %c0_i32_0 = arith.constant 0 : i32
    %c0_i32_1 = arith.constant 0 : i32
    %c0_i32_2 = arith.constant 0 : i32
    return %arg0, %c0_i32, %c0_i32_0, %c0_i32_1 : i32, i32, i32, i32
  }
  func.func @transform_1(%arg0: i32) -> (i32, i32, i32, i32) {
    %c0_i32 = arith.constant 0 : i32
    %c0_i32_0 = arith.constant 0 : i32
    %c0_i32_1 = arith.constant 0 : i32
    %c0_i32_2 = arith.constant 0 : i32
    return %arg0, %c0_i32, %c0_i32_0, %c0_i32_1 : i32, i32, i32, i32
  }
  func.func @transform_2(%arg0: i32) -> (i32, i32, i32, i32) {
    %c0_i32 = arith.constant 0 : i32
    %c0_i32_0 = arith.constant 0 : i32
    %c0_i32_1 = arith.constant 0 : i32
    %c0_i32_2 = arith.constant 0 : i32
    %c0_i32_3 = arith.constant 0 : i32
    return %c0_i32, %c0_i32_0, %c0_i32_1, %c0_i32_2 : i32, i32, i32, i32
  }
  func.func @transform_3(%arg0: i32) -> (i32, i32, i32, i32) {
    %c0_i32 = arith.constant 0 : i32
    %c0_i32_0 = arith.constant 0 : i32
    %c0_i32_1 = arith.constant 0 : i32
    %c0_i32_2 = arith.constant 0 : i32
    %c0_i32_3 = arith.constant 0 : i32
    return %c0_i32, %c0_i32_0, %c0_i32_1, %c0_i32_2 : i32, i32, i32, i32
  }
  func.func @transform_4(%arg0: i32) -> (i32, i32, i32, i32) {
    %c0_i32 = arith.constant 0 : i32
    %c0_i32_0 = arith.constant 0 : i32
    %c0_i32_1 = arith.constant 0 : i32
    %c0_i32_2 = arith.constant 0 : i32
    return %arg0, %c0_i32, %c0_i32_0, %c0_i32_1 : i32, i32, i32, i32
  }
}

</mosaic_0001>

<bundles_post_ra>
// kernel: down_layer_residual_2d.5
= control target key start
LH: loop header
LB: loop body
LE: loop exit
PB: predicated region body
PF: predicated region fallthrough
CT: control target
= control target key end

     0   :  { %s441_s15 = smov 0   ;;  %s475_s0 = inlined_call_operand.vmem [shape: f32[2,8,8,128], index: 0, kind: input, shape index: {}, may-alias: {0,4}]   ;;  %s476_s1 = inlined_call_operand.vmem [shape: bf16[2,8,8,128], index: 1, kind: input, shape index: {}]   ;;  %s477_s2 = inlined_call_operand.vmem [shape: f32[1,1,1,128], index: 2, kind: input, shape index: {}]   ;;  %s478_s3 = inlined_call_operand.vmem [shape: f32[1,1,1,128], index: 3, kind: input, shape index: {}]   ;;  %s479_s4 = inlined_call_operand.vmem [shape: f32[2,8,8,128], index: 4, kind: output, shape index: {}, may-alias: {0,4}]  }
   0x1 LB: > { %s363_s16 = sadd.s32 4294967295, %s414_s15   ;;  %p367_p0 = scmp.ge.s32.totalorder %s414_s15, 1  ;;  %s414_s15 = sphi %s441_s15, %s14_s15  }
   0x2   : > { %p172_p1 = scmp.lt.s32.totalorder %s414_s15, 3 }
   0x4   : > { %p173_p2 = pnand %p367_p0, %p172_p1 }
   0x5   : > { %p203_p3 = scmp.lt.s32.totalorder (!%p173_p2), %s363_s16, 1 }
   0x6   : > { %176 = sbr.rel (%p173_p2) target bundleno = 29 (0x1d), region = 36 }
   0xb   : > { %s481_s16 = smov (!%p203_p3, %s363_s16), 1  ;;  %v374_v1 = vld [vmem:[%s477_s2] ss:$0 sm:$0xff] }
   0xc   : > { %s378_s17 = sshll.u32 %s481_s16, 6  ;;  %s379_s18 = sshll.u32 %s481_s16, 5  ;;  %v375_v27 = vld [vmem:[%s478_s3] ss:$0 sm:$0xff] }
   0xd   : > { %s212_s21 = scalar_lea.vmem %s476_s1, %s379_s18  ;;  %s207_s24 = scalar_lea.vmem %s475_s0, %s378_s17 }
   0xe   : > { %v382_v0 = vld [vmem:[%s212_s21] sm:$0xff]   ;;  %v397_v4 = vld [vmem:[%s212_s21 + $0x8] sm:$0xff]   ;;  %v398_v5 = vld [vmem:[%s212_s21 + $0x10] sm:$0xff]   ;;  %s217_s5 = scalar_lea.vmem %s479_s4, %s378_s17 }
   0xf   : > { %v383_v2 = vunpack.c.l.bf16 %v382_v0  ;;  %v384_v3 = vunpack.c.h.bf16 %v382_v0  ;;  %v399_v6 = vld [vmem:[%s212_s21 + $0x18] sm:$0xff]   ;;  %v218_v7 = vld [vmem:[%s207_s24] sm:$0xff]  ;;  %v219_v8 = vld [vmem:[%s207_s24 + $0x8] sm:$0xff]  ;;  %v387_v10 = vunpack.c.l.bf16 %v397_v4  ;;  %v388_v11 = vunpack.c.h.bf16 %v397_v4 }
  0x10   : > { %v220_v9 = vld [vmem:[%s207_s24 + $0x10] sm:$0xff]  ;;  %v391_v12 = vunpack.c.l.bf16 %v398_v5  ;;  %v392_v13 = vunpack.c.h.bf16 %v398_v5  ;;  %v221_v14 = vld [vmem:[%s207_s24 + $0x18] sm:$0xff]  ;;  %v222_v15 = vld [vmem:[%s207_s24 + $0x20] sm:$0xff]  ;;  %v395_v17 = vunpack.c.l.bf16 %v399_v6  ;;  %v396_v18 = vunpack.c.h.bf16 %v399_v6 }
  0x11   : > { %v223_v16 = vld [vmem:[%s207_s24 + $0x28] sm:$0xff]  ;;  %v249_v19 = vmul.f32 %v383_v2, %v374_v1  ;;  %v250_v20 = vmul.f32 %v384_v3, %v374_v1  ;;  %v224_v21 = vld [vmem:[%s207_s24 + $0x30] sm:$0xff]  ;;  %v225_v22 = vld [vmem:[%s207_s24 + $0x38] sm:$0xff]  ;;  %v251_v23 = vmul.f32 %v387_v10, %v374_v1  ;;  %v252_v24 = vmul.f32 %v388_v11, %v374_v1 }
  0x12   : > { %v253_v25 = vmul.f32 %v391_v12, %v374_v1  ;;  %v254_v26 = vmul.f32 %v392_v13, %v374_v1  ;;  %v255_v28 = vmul.f32 %v395_v17, %v374_v1  ;;  %v256_v29 = vmul.f32 %v396_v18, %v374_v1 }
  0x13   : > { %v257_v30 = vadd.f32 %v249_v19, %v218_v7  ;;  %v258_v31 = vadd.f32 %v250_v20, %v219_v8  ;;  %v259_v32 = vadd.f32 %v251_v23, %v220_v9  ;;  %v260_v33 = vadd.f32 %v252_v24, %v221_v14 }
  0x14   : > { %v261_v34 = vadd.f32 %v253_v25, %v222_v15  ;;  %v262_v35 = vadd.f32 %v254_v26, %v223_v16  ;;  %v263_v36 = vadd.f32 %v255_v28, %v224_v21  ;;  %v264_v37 = vadd.f32 %v256_v29, %v225_v22 }
  0x15   : > { %v272_v38 = vadd.f32 %v375_v27, %v257_v30  ;;  %v273_v39 = vadd.f32 %v375_v27, %v258_v31  ;;  %v274_v40 = vadd.f32 %v375_v27, %v259_v32  ;;  %v275_v41 = vadd.f32 %v375_v27, %v260_v33 }
  0x16   : > { %v276_v42 = vadd.f32 %v375_v27, %v261_v34  ;;  %v277_v43 = vadd.f32 %v375_v27, %v262_v35  ;;  %v278_v44 = vadd.f32 %v375_v27, %v263_v36  ;;  %v279_v45 = vadd.f32 %v375_v27, %v264_v37 }
  0x17   : > { %v280_v46 = vmax.f32 %v272_v38, 0.0  ;;  %v281_v47 = vmax.f32 %v273_v39, 0.0  ;;  %v282_v48 = vmax.f32 %v274_v40, 0.0  ;;  %v283_v49 = vmax.f32 %v275_v41, 0.0 }
  0x18   : > { %v284_v50 = vmax.f32 %v276_v42, 0.0  ;;  %v285_v51 = vmax.f32 %v277_v43, 0.0  ;;  %v286_v52 = vmax.f32 %v278_v44, 0.0  ;;  %v287_v53 = vmax.f32 %v279_v45, 0.0 }
  0x19   : > { %288 = vst [vmem:[%s217_s5] sm:$0xff] %v280_v46  ;;  %289 = vst [vmem:[%s217_s5 + $0x8] sm:$0xff] %v281_v47 }
  0x1a   : > { %290 = vst [vmem:[%s217_s5 + $0x10] sm:$0xff] %v282_v48  ;;  %291 = vst [vmem:[%s217_s5 + $0x18] sm:$0xff] %v283_v49 }
  0x1b   : > { %292 = vst [vmem:[%s217_s5 + $0x20] sm:$0xff] %v284_v50  ;;  %293 = vst [vmem:[%s217_s5 + $0x28] sm:$0xff] %v285_v51 }
  0x1c   : > { %294 = vst [vmem:[%s217_s5 + $0x30] sm:$0xff] %v286_v52  ;;  %295 = vst [vmem:[%s217_s5 + $0x38] sm:$0xff] %v287_v53 }
  0x1d PF: > { %s14_s15 = sadd.s32 1, %s414_s15  }
  0x1e   : > { %p11_p4 = scmp.ge.s32.totalorder %s14_s15, 4  }
  0x20   :  { %13 = sbr.rel (!%p11_p4) target bundleno = 1 (0x1), region = 69 }

// kernel: down_layer_residual_2d.3
= control target key start
LH: loop header
LB: loop body
LE: loop exit
PB: predicated region body
PF: predicated region fallthrough
CT: control target
= control target key end

     0   :  { %s1210_s18 = smov 0   ;;  %s1456_s0 = inlined_call_operand.vmem [shape: bf16[2,9,9,16], index: 0, kind: input, shape index: {}]   ;;  %s1457_s1 = inlined_call_operand.vmem [shape: bf16[64,256], index: 1, kind: input, shape index: {}]   ;;  %s1458_s2 = inlined_call_operand.vmem [shape: bf16[2,8,8,128], index: 2, kind: output, shape index: {0}]   ;;  %s1459_s3 = inlined_call_operand.vmem [shape: f32[2,8,8,128], index: 3, kind: output, shape index: {1}]   ;;  %s1460_s4 = inlined_call_operand.vmem [shape: f32[2,1,128], index: 4, kind: output, shape index: {2}]   ;;  %s1461_s5 = inlined_call_operand.vmem [shape: f32[2,1,128], index: 5, kind: output, shape index: {3}]  }
   0x1 LB: > { %s1064_s19 = sadd.s32 4294967295, %s1177_s18   ;;  %p1068_p0 = scmp.ge.s32.totalorder %s1177_s18, 1  ;;  %s1177_s18 = sphi %s1210_s18, %s16_s18  }
   0x2   : > { %p194_p1 = scmp.lt.s32.totalorder %s1177_s18, 3 }
   0x4   : > { %p195_p2 = pnand %p1068_p0, %p194_p1 }
   0x5   : > { %p233_p3 = scmp.lt.s32.totalorder (!%p195_p2), %s1064_s19, 1 }
   0x6   : > { %198 = sbr.rel (%p195_p2) target bundleno = 302 (0x12e), region = 28 }
   0xb   : > { %v1151_v0 = vld [vmem:[%s1457_s1 + $0x4] ss:$8 sps:$4 sm:$0xff]   ;;  %v1153_v1 = vld [vmem:[%s1457_s1] ss:$8 sps:$4 sm:$0xff]   ;;  %v1179_v2 = vmov 0   ;;  %s1465_s19 = smov (!%p233_p3, %s1064_s19), 1 }
   0xc   : > { %574 = vmatprep.mubr.bf16.mxu1 %v1179_v2  ;;  %459 = vmatprep.mubr.bf16.mxu0 %v1179_v2  ;;  %v1154_v3 = vld [vmem:[%s1457_s1 + $0x14] ss:$8 sps:$4 sm:$0xff]   ;;  %v1156_v4 = vld [vmem:[%s1457_s1 + $0x10] ss:$8 sps:$4 sm:$0xff]   ;;  %v1160_v5 = vld [vmem:[%s1457_s1 + $0x24] ss:$8 sps:$4 sm:$0xff]   ;;  %s250_s27 = scalar_lea.vmem %s1460_s4, %s1465_s19 }
   0xd   : > { %556 = vmatprep.subr.bf16.mxu1 %v1151_v0  ;;  %441 = vmatprep.subr.bf16.mxu0 %v1154_v3  ;;  %s1141_s30 = smul.u32 72, %s1465_s19  ;;  %vm414_vm0 = vcmask 130048   ;;  %vm275_vm1 = vsmask.f32 3328  ;;  %vm276_vm2 = vsmask.f32 7440 }
   0xe   : > { %557 = vmatpush1.bf16.msra.mxu1 %v1153_v1  ;;  %442 = vmatpush1.bf16.msra.mxu0 %v1156_v4  ;;  %v1161_v6 = vld [vmem:[%s1457_s1 + $0x30] ss:$8 sps:$4 sm:$0xff]   ;;  %v1163_v7 = vld [vmem:[%s1457_s1 + $0x34] ss:$8 sps:$4 sm:$0xff]   ;;  %vm1277_vm3 = vmor %vm275_vm1, %vm276_vm2  ;;  %s1117_s15 = sshll.u32 %s1465_s19, 6  ;;  %s1116_s21 = sshll.u32 %s1465_s19, 5 }
   0xf   : > { %s1241_s8 = scalar_lea.vmem %s1456_s0, %s1141_s30  ;;  %659 = vmatprep.subr.bf16.mxu0 %v1160_v5  ;;  %791 = vmatprep.subr.bf16.mxu1 %v1163_v7  ;;  %v1158_v49 = vld [vmem:[%s1457_s1 + $0x20] ss:$8 sps:$4 sm:$0xff]   ;;  %s1408_s20 = scalar_lea.vmem %s1459_s3, %s1117_s15 }
  0x10   : > { %v255_v8 = vld [vmem:[%s1241_s8] sm:$0xf]  ;;  %v1251_v9 = vld [vmem:[%s1241_s8 + $0x8] sm:$0xf]  ;;  %v256_v10 = vld [vmem:[%s1241_s8 + $0x4] sm:$0x1]  ;;  %s1415_s24 = scalar_lea.vmem %s1458_s2, %s1116_s21  ;;  %s253_s30 = scalar_lea.vmem %s1461_s5, %s1465_s19 }
  0x11   : > { %v279_v11 = vshrl.u32 %v255_v8, 16  ;;  %v282_v12 = vshll.u32 %v255_v8, 16  ;;  %v293_v13 = vshrl.u32 %v1251_v9, 16  ;;  %v296_v14 = vshll.u32 %v1251_v9, 16  ;;  %v258_v15 = vld [vmem:[%s1241_s8 + $0xc] sm:$0x1] }
  0x12   : > { %v1084_v16 = vcombine.low %v255_v8, %v1251_v9  ;;  %v288_v17 = vshll.u32 %v256_v10, 16  ;;  %v302_v18 = vshll.u32 %v258_v15, 16  ;;  %v1259_v19 = vld [vmem:[%s1241_s8 + $0x10] sm:$0xf]  ;;  %v1262_v20 = vld [vmem:[%s1241_s8 + $0x18] sm:$0xf] }
  0x13   : > { %v281_v21 = vrot.slane %v279_v11, 4  ;;  %v284_v22 = vrot.slane %v282_v12, 5  ;;  %v295_v23 = vrot.slane %v293_v13, 4  ;;  %v298_v24 = vrot.slane %v296_v14, 5  ;;  %v260_v29 = vld [vmem:[%s1241_s8 + $0x14] sm:$0x1] }
  0x14   : > { %1090 = vmatmul.mubr.msk.bf16.vlgmr.msra.gmra.mxu1 %vm414_vm0, %v1084_v16  ;;  %v290_v25 = vrot.slane %v288_v17, 5  ;;  %v304_v26 = vrot.slane %v302_v18, 5  ;;  %v307_v27 = vshrl.u32 %v1259_v19, 16  ;;  %v310_v28 = vshll.u32 %v1259_v19, 16  ;;  %v262_v34 = vld [vmem:[%s1241_s8 + $0x1c] sm:$0x1] }
  0x15   : > { %v285_v30 = vor.u32 %v284_v22, %v281_v21  ;;  %v299_v31 = vor.u32 %v298_v24, %v295_v23  ;;  %792 = vmatpush1.bf16.msra.mxu1 %v1161_v6  ;;  %584 = vmatprep.mubr.bf16.mxu1 %v1179_v2  ;;  %v321_v32 = vshrl.u32 %v1262_v20, 16  ;;  %v324_v33 = vshll.u32 %v1262_v20, 16  ;;  %v1273_v35 = vld [vmem:[%s1241_s8 + $0x20] sm:$0xf]  ;;  %v1284_v47 = vld [vmem:[%s1241_s8 + $0x28] sm:$0xf] }
  0x16   : > { %v1085_v37 = vcombine.low %v1259_v19, %v1262_v20  ;;  %v309_v38 = vrot.slane %v307_v27, 4  ;;  %v312_v39 = vrot.slane %v310_v28, 5  ;;  %v316_v42 = vshll.u32 %v260_v29, 16  ;;  %v264_v54 = vld [vmem:[%s1241_s8 + $0x24] sm:$0x1] }
  0x17   : > { %v286_v40 = vrot.slane %v285_v30, 4  ;;  %v300_v41 = vrot.slane %v299_v31, 4  ;;  %v323_v43 = vrot.slane %v321_v32, 4  ;;  %v326_v45 = vrot.slane %v324_v33, 5  ;;  %v266_v59 = vld [vmem:[%s1241_s8 + $0x2c] sm:$0x1] }
  0x18   : > { %v313_v44 = vor.u32 %v312_v39, %v309_v38  ;;  %v330_v46 = vshll.u32 %v262_v34, 16  ;;  %v335_v48 = vshrl.u32 %v1273_v35, 16  ;;  %v318_v52 = vrot.slane %v316_v42, 5  ;;  %v1303_v63 = vld [vmem:[%s1241_s8 + $0x30] sm:$0xf] }
  0x19   : > { %v291_v50 = vsel %vm1277_vm3, %v286_v40, %v290_v25  ;;  %v1294_v51 = vsel %vm1277_vm3, %v300_v41, %v304_v26  ;;  %v338_v53 = vshll.u32 %v1273_v35, 16  ;;  %v327_v57 = vor.u32 %v326_v45, %v323_v43  ;;  %v1311_v8 = vld [vmem:[%s1241_s8 + $0x38] sm:$0xf]  ;;  %v268_v25 = vld [vmem:[%s1241_s8 + $0x34] sm:$0x1] }
  0x1a   : > { %v1074_v55 = vcombine.low %v291_v50, %v1294_v51  ;;  %v314_v56 = vrot.slane %v313_v44, 4  ;;  %v332_v58 = vrot.slane %v330_v46, 5  ;;  %v349_v60 = vshrl.u32 %v1284_v47, 16  ;;  %v270_v28 = vld [vmem:[%s1241_s8 + $0x3c] sm:$0x1] }
  0x1b   : > { %v352_v61 = vshll.u32 %v1284_v47, 16  ;;  %v337_v62 = vrot.slane %v335_v48, 4  ;;  %v328_v0 = vrot.slane %v327_v57, 4  ;;  %v340_v1 = vrot.slane %v338_v53, 5  ;;  %v271_v50 = vld [vmem:[%s1241_s8 + $0x40] sm:$0xf] }
  0x1c   : > { %1080 = vmatmul.mubr.msk.bf16.vlgmr.msra.gmra.mxu0 %vm414_vm0, %v1074_v55  ;;  %1091 = vmatmul.mubr.msk.bf16.gmra.mxu1 %vm414_vm0, %v1085_v37  ;;  %v344_v3 = vshll.u32 %v264_v54, 16  ;;  %v319_v4 = vsel %vm1277_vm3, %v314_v56, %v318_v52  ;;  %v351_v5 = vrot.slane %v349_v60, 4  ;;  %v358_v7 = vshll.u32 %v266_v59, 16 }
  0x1d   : > { %660 = vmatpush1.bf16.msra.mxu0 %v1158_v49  ;;  %469 = vmatprep.mubr.bf16.mxu0 %v1179_v2  ;;  %v354_v6 = vrot.slane %v352_v61, 5  ;;  %v333_v10 = vsel %vm1277_vm3, %v328_v0, %v332_v58  ;;  %v341_v11 = vor.u32 %v340_v1, %v337_v62  ;;  %v363_v12 = vshrl.u32 %v1303_v63, 16  ;;  %v272_v58 = vld [vmem:[%s1241_s8 + $0x44] sm:$0x1] }
  0x1e   : > { %594 = vmatprep.mubr.bf16.mxu1 %v1179_v2  ;;  %v1086_v13 = vcombine.low %v1273_v35, %v1284_v47  ;;  %v346_v14 = vrot.slane %v344_v3, 5  ;;  %v366_v16 = vshll.u32 %v1303_v63, 16  ;;  %v1075_v17 = vcombine.low %v319_v4, %v333_v10 }
  0x1f   : > { %v355_v15 = vor.u32 %v354_v6, %v351_v5  ;;  %v342_v18 = vrot.slane %v341_v11, 4  ;;  %v377_v21 = vshrl.u32 %v1311_v8, 16  ;;  %v380_v22 = vshll.u32 %v1311_v8, 16 }
  0x20   : > { %v360_v24 = vrot.slane %v358_v7, 5  ;;  %v365_v26 = vrot.slane %v363_v12, 4  ;;  %v368_v27 = vrot.slane %v366_v16, 5  ;;  %v372_v32 = vshll.u32 %v268_v25, 16 }
  0x21   : > { %v356_v23 = vrot.slane %v355_v15, 4  ;;  %v379_v29 = vrot.slane %v377_v21, 4  ;;  %v382_v30 = vrot.slane %v380_v22, 5  ;;  %v347_v31 = vsel %vm1277_vm3, %v342_v18, %v346_v14 }
  0x22   : > { %v369_v34 = vor.u32 %v368_v27, %v365_v26  ;;  %v386_v38 = vshll.u32 %v270_v28, 16  ;;  %v1087_v40 = vcombine.low %v1303_v63, %v1311_v8  ;;  %v374_v42 = vrot.slane %v372_v32, 5 }
  0x23   : > { %v361_v33 = vsel %vm1277_vm3, %v356_v23, %v360_v24  ;;  %v383_v37 = vor.u32 %v382_v30, %v379_v29  ;;  %v1104_v48 = vcombine.low %v1294_v51, %v319_v4  ;;  %v735_v52 = vshrl.u32 %v271_v50, 16 }
  0x24   : > { %1081 = vmatmul.mubr.msk.bf16.gmra.mxu0 %vm414_vm0, %v1075_v17  ;;  %1092 = vmatmul.mubr.msk.bf16.gmra.mxu1 %vm414_vm0, %v1086_v13  ;;  %v1076_v39 = vcombine.low %v347_v31, %v361_v33  ;;  %v370_v41 = vrot.slane %v369_v34, 4  ;;  %v388_v44 = vrot.slane %v386_v38, 5  ;;  %v738_v53 = vshll.u32 %v271_v50, 16 }
  0x25   : > { %479 = vmatprep.mubr.bf16.mxu0 %v1179_v2  ;;  %604 = vmatprep.mubr.bf16.mxu1 %v1179_v2  ;;  %v384_v43 = vrot.slane %v383_v37, 4  ;;  %v1094_v54 = vcombine.low %v1251_v9, %v1259_v19  ;;  %v1105_v55 = vcombine.low %v333_v10, %v347_v31  ;;  %v737_v56 = vrot.slane %v735_v52, 4 }
  0x26   : > { %v375_v45 = vsel %vm1277_vm3, %v370_v41, %v374_v42  ;;  %v740_v57 = vrot.slane %v738_v53, 5  ;;  %v744_v59 = vshll.u32 %v272_v58, 16  ;;  %v1095_v60 = vcombine.low %v1262_v20, %v1273_v35 }
  0x27   : > { %v389_v46 = vsel %vm1277_vm3, %v384_v43, %v388_v44  ;;  %v1106_v61 = vcombine.low %v361_v33, %v375_v45  ;;  %v1096_v0 = vcombine.low %v1284_v47, %v1303_v63  ;;  %v1097_v20 = vcombine.low %v1311_v8, %v271_v50 }
  0x28   : > { %v1077_v49 = vcombine.low %v375_v45, %v389_v46  ;;  %v741_v51 = vor.u32 %v740_v57, %v737_v56  ;;  %v746_v9 = vrot.slane %v744_v59, 5 }
  0x2a   : > { %v742_v62 = vrot.slane %v741_v51, 4 }
  0x2c   : > { %1082 = vmatmul.mubr.msk.bf16.gmra.mxu0 %vm414_vm0, %v1076_v39  ;;  %1093 = vmatmul.mubr.msk.bf16.gmra.mxu1 %vm414_vm0, %v1087_v40  ;;  %v747_v19 = vsel %vm1277_vm3, %v742_v62, %v746_v9 }
  0x2d   : > { %489 = vmatprep.mubr.bf16.mxu0 %v1179_v2  ;;  %809 = vmatprep.mubr.bf16.mxu1 %v1179_v2  ;;  %v1107_v1 = vcombine.low %v389_v46, %v747_v19 }
  0x34   : > { %1083 = vmatmul.mubr.msk.bf16.gmra.mxu0 %vm414_vm0, %v1077_v49  ;;  %1110 = vmatmul.mubr.msk.bf16.vlgmr.msra.gmra.mxu1 %vm414_vm0, %v1104_v48 }
  0x35   : > { %677 = vmatprep.mubr.bf16.mxu0 %v1179_v2  ;;  %819 = vmatprep.mubr.bf16.mxu1 %v1179_v2 }
  0x3c   : > { %1100 = vmatmul.mubr.msk.bf16.vlgmr.msra.gmra.mxu0 %vm414_vm0, %v1094_v54  ;;  %1111 = vmatmul.mubr.msk.bf16.gmra.mxu1 %vm414_vm0, %v1105_v55 }
  0x3d   : > { %687 = vmatprep.mubr.bf16.mxu0 %v1179_v2  ;;  %829 = vmatprep.mubr.bf16.mxu1 %v1179_v2 }
  0x44   : > { %1101 = vmatmul.mubr.msk.bf16.gmra.mxu0 %vm414_vm0, %v1095_v60  ;;  %1112 = vmatmul.mubr.msk.bf16.gmra.mxu1 %vm414_vm0, %v1106_v61 }
  0x45   : > { %697 = vmatprep.mubr.bf16.mxu0 %v1179_v2  ;;  %839 = vmatprep.mubr.bf16.mxu1 %v1179_v2 }
  0x4c   : > { %1102 = vmatmul.mubr.msk.bf16.gmra.mxu0 %vm414_vm0, %v1096_v0  ;;  %1113 = vmatmul.mubr.msk.bf16.gmra.mxu1 %vm414_vm0, %v1107_v1 }
  0x4d   : > { %707 = vmatprep.mubr.bf16.mxu0 %v1179_v2 }
  0x54   : > { %1103 = vmatmul.mubr.msk.bf16.gmra.mxu0 %vm414_vm0, %v1097_v20 }
  0xd4   : > { %v576_v35 = vpop.f32.mrf.mxu1 }
  0xd6   : > { %v578_v3 = vpop.f32.mrf.mxu1 }
  0xd8   : > { %v580_v4 = vpop.f32.mrf.mxu1 }
  0xda   : > { %v582_v5 = vpop.f32.mrf.mxu1 }
  0xdc   : > { %v461_v36 = vpop.f32.mrf.mxu0  ;;  %v586_v6 = vpop.f32.mrf.mxu1 }
  0xdd   : > { %v577_v41 = vadd.f32 %v576_v35, %v461_v36 }
  0xde   : > { %v463_v7 = vpop.f32.mrf.mxu0  ;;  %v588_v10 = vpop.f32.mrf.mxu1 }
  0xdf   : > { %v579_v42 = vadd.f32 %v578_v3, %v463_v7 }
  0xe0   : > { %v465_v47 = vpop.f32.mrf.mxu0  ;;  %v590_v63 = vpop.f32.mrf.mxu1 }
  0xe1   : > { %v581_v45 = vadd.f32 %v580_v4, %v465_v47 }
  0xe2   : > { %v467_v11 = vpop.f32.mrf.mxu0  ;;  %v1370_v12 = vpop.f32.mrf.mxu1 }
  0xe3   : > { %v583_v52 = vadd.f32 %v582_v5, %v467_v11 }
  0xe4   : > { %v471_v13 = vpop.f32.mrf.mxu0  ;;  %v1372_v14 = vpop.f32.mrf.mxu1 }
  0xe5   : > { %v587_v61 = vadd.f32 %v586_v6, %v471_v13 }
  0xe6   : > { %v473_v2 = vpop.f32.mrf.mxu0  ;;  %v1374_v8 = vpop.f32.mrf.mxu1 }
  0xe7   : > { %v589_v62 = vadd.f32 %v588_v10, %v473_v2 }
  0xe8   : > { %v475_v15 = vpop.f32.mrf.mxu0  ;;  %v1376_v16 = vpop.f32.mrf.mxu1 }
  0xe9   : > { %v591_v20 = vadd.f32 %v590_v63, %v475_v15 }
  0xea   : > { %v477_v17 = vpop.f32.mrf.mxu0  ;;  %v1378_v18 = vpop.f32.mrf.mxu1 }
  0xeb   : > { %v593_v36 = vadd.f32 %v1370_v12, %v477_v17 }
  0xec   : > { %v1380_v21 = vpop.f32.mrf.mxu0  ;;  %v1382_v22 = vpop.f32.mrf.mxu1 }
  0xed   : > { %v597_v63 = vadd.f32 %v1372_v14, %v1380_v21 }
  0xee   : > { %v1384_v23 = vpop.f32.mrf.mxu0  ;;  %v1386_v24 = vpop.f32.mrf.mxu1 }
  0xf0   : > { %v1388_v25 = vpop.f32.mrf.mxu0  ;;  %v1390_v26 = vpop.f32.mrf.mxu1 }
  0xf2   : > { %v1392_v27 = vpop.f32.mrf.mxu0  ;;  %v1394_v28 = vpop.f32.mrf.mxu1 }
  0xf4   : > { %v1396_v29 = vpop.f32.mrf.mxu0  ;;  %v811_v30 = vpop.f32.mrf.mxu1 }
  0xf6   : > { %v1398_v31 = vpop.f32.mrf.mxu0  ;;  %v813_v32 = vpop.f32.mrf.mxu1 }
  0xf8   : > { %v1400_v33 = vpop.f32.mrf.mxu0  ;;  %v815_v34 = vpop.f32.mrf.mxu1 }
  0xfa   : > { %v1402_v37 = vpop.f32.mrf.mxu0  ;;  %v817_v38 = vpop.f32.mrf.mxu1 }
  0xfc   : > { %v679_v39 = vpop.f32.mrf.mxu0  ;;  %v821_v40 = vpop.f32.mrf.mxu1 }
  0xfd   : > { %v718_v46 = vadd.f32 %v679_v39, %v577_v41  ;;  %v601_v39 = vadd.f32 %v1376_v16, %v1388_v25 }
  0xfe   : > { %v681_v43 = vpop.f32.mrf.mxu0  ;;  %v823_v44 = vpop.f32.mrf.mxu1 }
  0xff   : > { %v719_v48 = vadd.f32 %v681_v43, %v579_v42  ;;  %v850_v57 = vadd.f32 %v811_v30, %v718_v46  ;;  %v599_v30 = vadd.f32 %v1374_v8, %v1384_v23  ;;  %v603_v8 = vadd.f32 %v1378_v18, %v1392_v27 }
 0x100   : > { %v683_v49 = vpop.f32.mrf.mxu0  ;;  %v825_v50 = vpop.f32.mrf.mxu1  ;;  %v609_v18 = vadd.f32 %v1386_v24, %v1398_v31  ;;  %v613_v24 = vadd.f32 %v1394_v28, %v1402_v37 }
 0x101   : > { %v851_v53 = vadd.f32 %v813_v32, %v719_v48  ;;  %v720_v54 = vadd.f32 %v683_v49, %v581_v45  ;;  %v904_v41 = vmul.f32 %v850_v57, %v850_v57 }
 0x102   : > { %v685_v55 = vpop.f32.mrf.mxu0  ;;  %v827_v56 = vpop.f32.mrf.mxu1 }
 0x103   : > { %882 = vst [vmem:[%s1408_s20] sm:$0xff] %v851_v53  ;;  %v852_v58 = vadd.f32 %v815_v34, %v720_v54  ;;  %v721_v51 = vadd.f32 %v685_v55, %v583_v52  ;;  %v607_v52 = vadd.f32 %v1382_v22, %v1396_v29 }
 0x104   : > { %v689_v59 = vpop.f32.mrf.mxu0  ;;  %v831_v60 = vpop.f32.mrf.mxu1 }
 0x105   : > { %v1121_v9 = vpack.c.bf16 %v852_v58, %v850_v57  ;;  %v853_v19 = vadd.f32 %v817_v38, %v721_v51  ;;  %v722_v35 = vadd.f32 %v689_v59, %v587_v61  ;;  %v905_v12 = vmul.f32 %v852_v58, %v852_v58 }
 0x106   : > { %v691_v0 = vpop.f32.mrf.mxu0  ;;  %v833_v1 = vpop.f32.mrf.mxu1  ;;  %v890_v23 = vadd.f32 %v852_v58, %v850_v57 }
 0x107   : > { %1122 = vst [vmem:[%s1415_s24] sm:$0xff] %v1121_v9   ;;  %883 = vst [vmem:[%s1408_s20 + $0x8] sm:$0xff] %v853_v19  ;;  %v723_v3 = vadd.f32 %v691_v0, %v589_v62  ;;  %v854_v6 = vadd.f32 %v821_v40, %v722_v35  ;;  %v912_v46 = vadd.f32 %v905_v12, %v904_v41 }
 0x108   : > { %v693_v4 = vpop.f32.mrf.mxu0  ;;  %v835_v5 = vpop.f32.mrf.mxu1  ;;  %v611_v62 = vadd.f32 %v1390_v26, %v1400_v33 }
 0x109   : > { %v855_v7 = vadd.f32 %v823_v44, %v723_v3  ;;  %v724_v47 = vadd.f32 %v693_v4, %v591_v20  ;;  %v906_v42 = vmul.f32 %v854_v6, %v854_v6 }
 0x10a   : > { %v695_v11 = vpop.f32.mrf.mxu0  ;;  %v837_v15 = vpop.f32.mrf.mxu1 }
 0x10b   : > { %884 = vst [vmem:[%s1408_s20 + $0x10] sm:$0xff] %v855_v7  ;;  %v856_v10 = vadd.f32 %v825_v50, %v724_v47  ;;  %v725_v13 = vadd.f32 %v695_v11, %v593_v36  ;;  %v891_v50 = vadd.f32 %v890_v23, %v854_v6  ;;  %v913_v53 = vadd.f32 %v912_v46, %v906_v42 }
 0x10c   : > { %v699_v2 = vpop.f32.mrf.mxu0  ;;  %v841_v43 = vpop.f32.mrf.mxu1 }
 0x10d   : > { %v1126_v32 = vpack.c.bf16 %v856_v10, %v854_v6  ;;  %v857_v34 = vadd.f32 %v827_v56, %v725_v13  ;;  %v726_v17 = vadd.f32 %v699_v2, %v597_v63  ;;  %v907_v48 = vmul.f32 %v856_v10, %v856_v10 }
 0x10e   : > { %v701_v38 = vpop.f32.mrf.mxu0  ;;  %v843_v55 = vpop.f32.mrf.mxu1  ;;  %v892_v27 = vadd.f32 %v891_v50, %v856_v10 }
 0x10f   : > { %1138 = vst [vmem:[%s1415_s24 + $0x8] sm:$0xff] %v1126_v32   ;;  %885 = vst [vmem:[%s1408_s20 + $0x18] sm:$0xff] %v857_v34  ;;  %v727_v40 = vadd.f32 %v701_v38, %v599_v30  ;;  %v858_v14 = vadd.f32 %v831_v60, %v726_v17  ;;  %v914_v51 = vadd.f32 %v913_v53, %v907_v48 }
 0x110   : > { %v703_v21 = vpop.f32.mrf.mxu0  ;;  %v845_v0 = vpop.f32.mrf.mxu1 }
 0x111   : > { %v859_v44 = vadd.f32 %v833_v1, %v727_v40  ;;  %v728_v45 = vadd.f32 %v703_v21, %v601_v39  ;;  %v908_v54 = vmul.f32 %v858_v14, %v858_v14  ;;  %v893_v9 = vadd.f32 %v892_v27, %v858_v14 }
 0x112   : > { %v705_v49 = vpop.f32.mrf.mxu0  ;;  %v847_v47 = vpop.f32.mrf.mxu1 }
 0x113   : > { %886 = vst [vmem:[%s1408_s20 + $0x20] sm:$0xff] %v859_v44  ;;  %v860_v16 = vadd.f32 %v835_v5, %v728_v45  ;;  %v729_v25 = vadd.f32 %v705_v49, %v603_v8  ;;  %v915_v29 = vadd.f32 %v914_v51, %v908_v54 }
 0x114   : > { %v709_v56 = vpop.f32.mrf.mxu0 }
 0x115   : > { %v1131_v57 = vpack.c.bf16 %v860_v16, %v858_v14  ;;  %v861_v58 = vadd.f32 %v837_v15, %v729_v25  ;;  %v909_v59 = vmul.f32 %v860_v16, %v860_v16  ;;  %v730_v60 = vadd.f32 %v709_v56, %v607_v52 }
 0x116   : > { %v711_v61 = vpop.f32.mrf.mxu0  ;;  %v894_v31 = vadd.f32 %v893_v9, %v860_v16 }
 0x117   : > { %1139 = vst [vmem:[%s1415_s24 + $0x10] sm:$0xff] %v1131_v57   ;;  %887 = vst [vmem:[%s1408_s20 + $0x28] sm:$0xff] %v861_v58  ;;  %v731_v22 = vadd.f32 %v711_v61, %v609_v18  ;;  %v862_v19 = vadd.f32 %v841_v43, %v730_v60  ;;  %v916_v3 = vadd.f32 %v915_v29, %v909_v59 }
 0x118   : > { %v713_v1 = vpop.f32.mrf.mxu0 }
 0x119   : > { %v863_v20 = vadd.f32 %v843_v55, %v731_v22  ;;  %v732_v35 = vadd.f32 %v713_v1, %v611_v62  ;;  %v910_v4 = vmul.f32 %v862_v19, %v862_v19  ;;  %v895_v33 = vadd.f32 %v894_v31, %v862_v19 }
 0x11a   : > { %v715_v26 = vpop.f32.mrf.mxu0 }
 0x11b   : > { %888 = vst [vmem:[%s1408_s20 + $0x30] sm:$0xff] %v863_v20  ;;  %v864_v5 = vadd.f32 %v845_v0, %v732_v35  ;;  %v733_v36 = vadd.f32 %v715_v26, %v613_v24  ;;  %v917_v7 = vadd.f32 %v916_v3, %v910_v4 }
 0x11d   : > { %v1136_v11 = vpack.c.bf16 %v864_v5, %v862_v19  ;;  %v896_v6 = vadd.f32 %v895_v33, %v864_v5  ;;  %v911_v10 = vmul.f32 %v864_v5, %v864_v5  ;;  %v865_v13 = vadd.f32 %v847_v47, %v733_v36 }
 0x11f   : > { %1140 = vst [vmem:[%s1415_s24 + $0x18] sm:$0xff] %v1136_v11   ;;  %v897_v28 = vrot.slane %v896_v6, 4  ;;  %v918_v37 = vadd.f32 %v917_v7, %v911_v10  ;;  %889 = vst [vmem:[%s1408_s20 + $0x38] sm:$0xff] %v865_v13 }
 0x121   : > { %v898_v63 = vadd.f32 %v897_v28, %v896_v6  ;;  %v919_v2 = vrot.slane %v918_v37, 4 }
 0x123   : > { %v899_v15 = vrot.slane %v898_v63, 2  ;;  %v920_v30 = vadd.f32 %v919_v2, %v918_v37 }
 0x125   : > { %v900_v32 = vadd.f32 %v899_v15, %v898_v63  ;;  %v921_v34 = vrot.slane %v920_v30, 2 }
 0x127   : > { %v901_v12 = vrot.slane %v900_v32, 1  ;;  %v922_v17 = vadd.f32 %v921_v34, %v920_v30 }
 0x129   : > { %v902_v38 = vadd.f32 %v901_v12, %v900_v32  ;;  %v923_v39 = vrot.slane %v922_v17, 1 }
 0x12b   : > { %903 = vst [vmem:[%s250_s27] sm:$0x1] %v902_v38  ;;  %v924_v40 = vadd.f32 %v923_v39, %v922_v17 }
 0x12d   : > { %925 = vst [vmem:[%s253_s30] sm:$0x1] %v924_v40 }
 0x12e PF: > { %s16_s18 = sadd.s32 1, %s1177_s18  }
 0x12f   : > { %p13_p4 = scmp.ge.s32.totalorder %s16_s18, 4  }
 0x131   :  { %15 = sbr.rel (!%p13_p4) target bundleno = 1 (0x1), region = 94 }

// kernel: down_layer_residual_2d.4
= control target key start
LH: loop header
LB: loop body
LE: loop exit
PB: predicated region body
PF: predicated region fallthrough
CT: control target
= control target key end

     0   :  { %s3310_s21 = smov 0   ;;  %s4021_s0 = inlined_call_operand.vmem [shape: bf16[2,8,8,128], index: 0, kind: input, shape index: {}]   ;;  %s4022_s1 = inlined_call_operand.vmem [shape: f32[1,1,128], index: 1, kind: input, shape index: {}]   ;;  %s4023_s2 = inlined_call_operand.vmem [shape: f32[1,1,128], index: 2, kind: input, shape index: {}]   ;;  %s4024_s3 = inlined_call_operand.vmem [shape: bf16[1152,128], index: 3, kind: input, shape index: {}]   ;;  %s4025_s4 = inlined_call_operand.vmem [shape: bf16[2,8,8,128], index: 4, kind: output, shape index: {0}]   ;;  %s4026_s5 = inlined_call_operand.vmem [shape: f32[2,1,128], index: 5, kind: output, shape index: {1}]   ;;  %s4027_s6 = inlined_call_operand.vmem [shape: f32[2,1,128], index: 6, kind: output, shape index: {2}]  }
   0x1 LB: > { %s2628_s22 = sadd.s32 4294967295, %s3272_s21   ;;  %p2632_p0 = scmp.ge.s32.totalorder %s3272_s21, 1  ;;  %s3272_s21 = sphi %s3310_s21, %s17_s21  }
   0x2   : > { %p217_p1 = scmp.lt.s32.totalorder %s3272_s21, 3 }
   0x4   : > { %p218_p2 = pnand %p2632_p0, %p217_p1 }
   0x6   : > { %221 = sbr.rel (%p218_p2) target bundleno = 414 (0x19e), region = 36 }
   0xb   : > { %v3182_v0 = vld [vmem:[%s4024_s3 + $0x38] sm:$0xff]   ;;  %p3323_p3 = scmp.lt.s32.totalorder %s2628_s22, 1  ;;  %v3183_v1 = vld [vmem:[%s4024_s3 + $0x30] sm:$0xff]   ;;  %v3274_v3 = vmov 0   ;;  %v3185_v4 = vld [vmem:[%s4024_s3 + $0x28] sm:$0xff]   ;;  %vm457_vm0 = vcmask 1043456  }
   0xc   : > { %2965 = vmatprep.subr.bf16.mxu1 %v3182_v0  ;;  %v3184_v2 = vld [vmem:[%s4024_s3 + $0x78] sm:$0xff]   ;;  %324 = vst [vmem:[#allocation2] sm:$0xf] %v3274_v3  ;;  %326 = vst [vmem:[#allocation2 + $0x8] sm:$0xf] %v3274_v3  ;;  %v3186_v5 = vld [vmem:[%s4024_s3 + $0x70] sm:$0xff]  }
   0xd   : > { %325 = vst [vmem:[#allocation2 + $0x4] sm:$0x1] %v3274_v3  ;;  %327 = vst [vmem:[#allocation2 + $0xc] sm:$0x1] %v3274_v3  ;;  %2966 = vmatpush3.bf16.msra.mxu1 %v3182_v0  ;;  %2941 = vmatprep.subr.bf16.mxu0 %v3184_v2  ;;  %s4058_s22 = smov (!%p3323_p3, %s2628_s22), 1  ;;  %v3188_v6 = vld [vmem:[%s4024_s3 + $0x68] sm:$0xff]  }
   0xe   : > { %328 = vst [vmem:[#allocation2 + $0x10] sm:$0xf] %v3274_v3  ;;  %329 = vst [vmem:[#allocation2 + $0x14] sm:$0x1] %v3274_v3  ;;  %2967 = vmatprep.subr.bf16.mxu1 %v3183_v1  ;;  %2942 = vmatpush3.bf16.msra.mxu0 %v3184_v2  ;;  %v3187_v7 = vld [vmem:[%s4024_s3 + $0x20] sm:$0xff]   ;;  %s2781_s14 = sshll.u32 %s4058_s22, 5  ;;  %s265_s8 = scalar_lea.vmem %s4026_s5, %s4058_s22 }
   0xf   : > { %330 = vst [vmem:[#allocation2 + $0x18] sm:$0xf] %v3274_v3  ;;  %331 = vst [vmem:[#allocation2 + $0x1c] sm:$0x1] %v3274_v3  ;;  %2943 = vmatprep.subr.bf16.mxu0 %v3186_v5  ;;  %v3190_v8 = vld [vmem:[%s4024_s3 + $0x60] sm:$0xff]   ;;  %v3189_v9 = vld [vmem:[%s4024_s3 + $0x18] sm:$0xff]   ;;  %s3363_s23 = scalar_lea.vmem %s4021_s0, %s2781_s14  ;;  %s3995_s30 = scalar_lea.vmem %s4025_s4, %s2781_s14 }
  0x10   : > { %332 = vst [vmem:[#allocation2 + $0x20] sm:$0xf] %v3274_v3  ;;  %333 = vst [vmem:[#allocation2 + $0x24] sm:$0x1] %v3274_v3  ;;  %v3192_v10 = vld [vmem:[%s4024_s3 + $0x58] sm:$0xff]   ;;  %v2792_v11 = vld [vmem:[%s3363_s23] sm:$0xff]   ;;  %s268_s11 = scalar_lea.vmem %s4027_s6, %s4058_s22 }
  0x11   : > { %334 = vst [vmem:[#allocation2 + $0x28] sm:$0xf] %v3274_v3  ;;  %335 = vst [vmem:[#allocation2 + $0x2c] sm:$0x1] %v3274_v3  ;;  %2968 = vmatpush3.bf16.msra.mxu1 %v3183_v1  ;;  %v3372_v12 = vld [vmem:[%s4022_s1] ss:$0 sm:$0xff]  ;;  %v2793_v14 = vunpack.c.l.bf16 %v2792_v11  ;;  %v2794_v15 = vunpack.c.h.bf16 %v2792_v11 }
  0x12   : > { %336 = vst [vmem:[#allocation2 + $0x30] sm:$0xf] %v3274_v3  ;;  %337 = vst [vmem:[#allocation2 + $0x34] sm:$0x1] %v3274_v3  ;;  %2969 = vmatprep.subr.bf16.mxu1 %v3185_v4  ;;  %2944 = vmatpush3.bf16.msra.mxu0 %v3186_v5  ;;  %v3191_v13 = vld [vmem:[%s4024_s3 + $0x10] sm:$0xff]   ;;  %v2827_v20 = vld [vmem:[%s3363_s23 + $0x8] sm:$0xff]  }
  0x13   : > { %338 = vst [vmem:[#allocation2 + $0x38] sm:$0xf] %v3274_v3  ;;  %339 = vst [vmem:[#allocation2 + $0x3c] sm:$0x1] %v3274_v3  ;;  %2945 = vmatprep.subr.bf16.mxu0 %v3188_v6  ;;  %v3380_v16 = vld [vmem:[%s4023_s2] ss:$0 sm:$0xff]  ;;  %v293_v19 = vmul.f32 %v2793_v14, %v3372_v12  ;;  %v294_v21 = vmul.f32 %v2794_v15, %v3372_v12  ;;  %v2797_v22 = vunpack.c.l.bf16 %v2827_v20  ;;  %v2798_v29 = vunpack.c.h.bf16 %v2827_v20 }
  0x14   : > { %340 = vst [vmem:[#allocation2 + $0x40] sm:$0xf] %v3274_v3  ;;  %341 = vst [vmem:[#allocation2 + $0x44] sm:$0x1] %v3274_v3  ;;  %v3382_v17 = vld [vmem:[#allocation2] sm:$0xf] }
  0x15   : > { %342 = vst [vmem:[#allocation2 + $0x48] sm:$0xf] %v3274_v3  ;;  %343 = vst [vmem:[#allocation2 + $0x4c] sm:$0x1] %v3274_v3  ;;  %2970 = vmatpush3.bf16.msra.mxu1 %v3185_v4  ;;  %v3194_v18 = vld [vmem:[%s4024_s3 + $0x50] sm:$0xff]   ;;  %v3193_v23 = vld [vmem:[%s4024_s3 + $0x8] sm:$0xff]   ;;  %v308_v24 = vadd.f32 %v3380_v16, %v293_v19  ;;  %v309_v26 = vadd.f32 %v3380_v16, %v294_v21  ;;  %v295_v28 = vmul.f32 %v2797_v22, %v3372_v12 }
  0x16   : > { %2971 = vmatprep.subr.bf16.mxu1 %v3187_v7  ;;  %2946 = vmatpush3.bf16.msra.mxu0 %v3188_v6  ;;  %v547_v25 = vshrl.u32 %v3382_v17, 16  ;;  %v550_v27 = vshll.u32 %v3382_v17, 16  ;;  %v3196_v30 = vld [vmem:[%s4024_s3 + $0x48] sm:$0xff]   ;;  %vm458_vm1 = vsmask.f32 7938  ;;  %vm463_vm2 = vcmask 1040384  }
  0x17   : > { %2947 = vmatprep.subr.bf16.mxu0 %v3190_v8  ;;  %v316_v31 = vmax.f32 %v308_v24, 0.0  ;;  %v317_v32 = vmax.f32 %v309_v26, 0.0  ;;  %v310_v33 = vadd.f32 %v3380_v16, %v295_v28  ;;  %v3195_v34 = vld [vmem:[%s4024_s3] sm:$0xff]   ;;  %vm464_vm3 = vsmask.f32 256  ;;  %v3411_v43 = vld [vmem:[%s4024_s3 + $0xf8] sm:$0xff]   ;;  %vm3420_vm4 = vmand %vm457_vm0, %vm458_vm1 }
  0x18   : > { %v3405_v36 = vrot.slane %v547_v25, 4  ;;  %v552_v38 = vrot.slane %v550_v27, 5  ;;  %v296_v40 = vmul.f32 %v2798_v29, %v3372_v12  ;;  %v3200_v46 = vld [vmem:[%s4024_s3 + $0x40] sm:$0xff]   ;;  %v460_v47 = vld [vmem:[#allocation2 + $0x8] sm:$0xf]  ;;  %v3427_v55 = vld [vmem:[%s4024_s3 + $0xb8] sm:$0xff]  }
  0x19   : > { %2972 = vmatpush3.bf16.msra.mxu1 %v3187_v7  ;;  %v2783_v35 = vpack.c.bf16 %v316_v31, %v316_v31  ;;  %v2784_v37 = vpack.c.bf16 %v317_v32, %v317_v32  ;;  %v318_v39 = vmax.f32 %v310_v33, 0.0  ;;  %v469_v49 = vld [vmem:[#allocation2 + $0x10] sm:$0xf]  ;;  %v466_v50 = vld [vmem:[#allocation2 + $0xc] sm:$0x1]  ;;  %vm3431_vm5 = vmand %vm463_vm2, %vm464_vm3  ;;  %vm964_vm9 = vcmask 1042432  }
  0x1a   : > { %2973 = vmatprep.subr.bf16.mxu1 %v3189_v9  ;;  %2948 = vmatpush3.bf16.msra.mxu0 %v3190_v8  ;;  %v3416_v51 = vld [vmem:[#allocation2 + $0x4] sm:$0x1]  ;;  %v472_v59 = vld [vmem:[#allocation2 + $0x14] sm:$0x1]  ;;  %v311_v60 = vadd.f32 %v3380_v16, %v296_v40  ;;  %v475_v1 = vld [vmem:[#allocation2 + $0x18] sm:$0xf]  ;;  %v553_v3 = vor.u32 %v552_v38, %v3405_v36 }
  0x1b   : > { %2949 = vmatprep.subr.bf16.mxu0 %v3192_v10  ;;  %v377_v41 = vshrl.u32 %v2783_v35, 16  ;;  %v380_v42 = vshll.u32 %v2783_v35, 16  ;;  %v385_v44 = vshrl.u32 %v2784_v37, 16  ;;  %v388_v45 = vshll.u32 %v2784_v37, 16  ;;  %v3463_v26 = vld [vmem:[%s3363_s23 + $0x18] sm:$0xff]   ;;  %v3225_v53 = vld [vmem:[%s4024_s3 + $0x160] sm:$0xff]  }
  0x1c   : > { %v2785_v48 = vpack.c.bf16 %v318_v39, %v318_v39  ;;  %v556_v4 = vshll.u32 %v3416_v51, 16  ;;  %vm543_vm6 = vsmask.f32 3328  ;;  %vm544_vm7 = vsmask.f32 7440  ;;  %v3259_v24 = vld [vmem:[%s4024_s3 + $0x220] sm:$0xff]  }
  0x1d   : > { %2974 = vmatpush3.bf16.msra.mxu1 %v3189_v9  ;;  %v379_v52 = vrot.slane %v377_v41, 7  ;;  %v387_v54 = vrot.slane %v385_v44, 7  ;;  %v478_v9 = vld [vmem:[#allocation2 + $0x1c] sm:$0x1]  ;;  %v319_v14 = vmax.f32 %v311_v60, 0.0  ;;  %v3453_v21 = vrot.slane %v553_v3, 4  ;;  %vm3457_vm8 = vmor %vm543_vm6, %vm544_vm7 }
  0x1e   : > { %2975 = vmatprep.subr.bf16.mxu1 %v3191_v13  ;;  %2950 = vmatpush3.bf16.msra.mxu0 %v3192_v10  ;;  %v393_v56 = vshrl.u32 %v2785_v48, 16  ;;  %v396_v57 = vshll.u32 %v2785_v48, 16  ;;  %v3455_v22 = vrot.slane %v556_v4, 5  ;;  %v969_v28 = vrot.slane %v3416_v51, 5 }
  0x1f   : > { %2951 = vmatprep.subr.bf16.mxu0 %v3194_v18  ;;  %v382_v61 = vor.u32 %v380_v42, %v379_v52  ;;  %v383_v62 = vrot.slane %v379_v52, 4  ;;  %v390_v63 = vor.u32 %v388_v45, %v387_v54  ;;  %v391_v0 = vrot.slane %v387_v54, 4 }
  0x20   : > { %v395_v2 = vrot.slane %v393_v56, 7  ;;  %vm965_vm10 = vcmask 1046532  }
  0x21   : > { %2976 = vmatpush3.bf16.msra.mxu1 %v3191_v13  ;;  %v461_v5 = vsel %vm3420_vm4, %v382_v61, %v460_v47  ;;  %v470_v6 = vsel %vm3420_vm4, %v390_v63, %v469_v49  ;;  %v467_v7 = vsel %vm3431_vm5, %v383_v62, %v466_v50  ;;  %v473_v8 = vsel %vm3431_vm5, %v391_v0, %v472_v59  ;;  %v2828_v13 = vld [vmem:[%s3363_s23 + $0x10] sm:$0xff]   ;;  %vm3580_vm11 = vmor %vm964_vm9, %vm965_vm10 }
  0x22   : > { %2977 = vmatprep.subr.bf16.mxu1 %v3193_v23  ;;  %2952 = vmatpush3.bf16.msra.mxu0 %v3194_v18  ;;  %462 = vst [vmem:[#allocation2 + $0x8] sm:$0xf] %v461_v5  ;;  %v398_v10 = vor.u32 %v396_v57, %v395_v2  ;;  %v399_v11 = vrot.slane %v395_v2, 4  ;;  %471 = vst [vmem:[#allocation2 + $0x10] sm:$0xf] %v470_v6  ;;  %v2801_v19 = vunpack.c.l.bf16 %v2828_v13  ;;  %v2802_v20 = vunpack.c.h.bf16 %v2828_v13  ;;  %v3201_v57 = vld [vmem:[%s4024_s3 + $0xf0] sm:$0xff]  }
  0x23   : > { %2953 = vmatprep.subr.bf16.mxu0 %v3196_v30  ;;  %468 = vst [vmem:[#allocation2 + $0xc] sm:$0x1] %v467_v7  ;;  %474 = vst [vmem:[#allocation2 + $0x14] sm:$0x1] %v473_v8  ;;  %v3203_v2 = vld [vmem:[%s4024_s3 + $0xe8] sm:$0xff]  }
  0x24   : > { %v476_v15 = vsel %vm3420_vm4, %v398_v10, %v475_v1  ;;  %v479_v18 = vsel %vm3431_vm5, %v399_v11, %v478_v9  ;;  %v297_v25 = vmul.f32 %v2801_v19, %v3372_v12  ;;  %v298_v27 = vmul.f32 %v2802_v20, %v3372_v12  ;;  %v481_v5 = vld [vmem:[#allocation2 + $0x20] sm:$0xf] }
  0x25   : > { %2978 = vmatpush3.bf16.msra.mxu1 %v3193_v23  ;;  %477 = vst [vmem:[#allocation2 + $0x18] sm:$0xf] %v476_v15  ;;  %480 = vst [vmem:[#allocation2 + $0x1c] sm:$0x1] %v479_v18  ;;  %v2786_v23 = vpack.c.bf16 %v319_v14, %v319_v14 }
  0x26   : > { %2979 = vmatprep.subr.bf16.mxu1 %v3195_v34  ;;  %2954 = vmatpush3.bf16.msra.mxu0 %v3196_v30  ;;  %v2805_v30 = vunpack.c.l.bf16 %v3463_v26  ;;  %v312_v35 = vadd.f32 %v3380_v16, %v297_v25  ;;  %v313_v45 = vadd.f32 %v3380_v16, %v298_v27  ;;  %v3205_v25 = vld [vmem:[%s4024_s3 + $0xe0] sm:$0xff]  }
  0x27   : > { %2955 = vmatprep.subr.bf16.mxu0 %v3200_v46  ;;  %v401_v29 = vshrl.u32 %v2786_v23, 16  ;;  %v404_v63 = vshll.u32 %v2786_v23, 16 }
  0x28   : > { %v299_v50 = vmul.f32 %v2805_v30, %v3372_v12  ;;  %v320_v8 = vmax.f32 %v312_v35, 0.0  ;;  %v321_v14 = vmax.f32 %v313_v45, 0.0 }
  0x29   : > { %2980 = vmatpush3.bf16.msra.mxu1 %v3195_v34  ;;  %v512_v31 = vld [vmem:[#allocation2 + $0x8] sm:$0xf]  ;;  %v513_v32 = vld [vmem:[#allocation2 + $0x10] sm:$0xf]  ;;  %v559_v34 = vsel %vm3457_vm8, %v3453_v21, %v3455_v22  ;;  %v403_v9 = vrot.slane %v401_v29, 7 }
  0x2a   : > { %3013 = vmatprep.subr.bf16.mxu1 %v3411_v43  ;;  %2956 = vmatpush3.bf16.msra.mxu0 %v3200_v46  ;;  %v3468_v33 = vld [vmem:[#allocation2 + $0xc] sm:$0x1]  ;;  %v561_v36 = vshrl.u32 %v512_v31, 16  ;;  %v564_v37 = vshll.u32 %v512_v31, 16  ;;  %v2659_v38 = vcombine.low %v3382_v17, %v512_v31  ;;  %v575_v39 = vshrl.u32 %v513_v32, 16 }
  0x2b   : > { %2989 = vmatprep.subr.bf16.mxu0 %v3427_v55  ;;  %v3476_v40 = vld [vmem:[#allocation2 + $0x14] sm:$0x1]  ;;  %v578_v41 = vshll.u32 %v513_v32, 16  ;;  %v570_v42 = vshll.u32 %v3468_v33, 16  ;;  %v314_v13 = vadd.f32 %v3380_v16, %v299_v50  ;;  %v2787_v18 = vpack.c.bf16 %v320_v8, %v320_v8  ;;  %v484_v21 = vld [vmem:[#allocation2 + $0x24] sm:$0x1] }
  0x2c   : > { %v584_v44 = vshll.u32 %v3476_v40, 16  ;;  %v563_v46 = vrot.slane %v561_v36, 4  ;;  %v566_v47 = vrot.slane %v564_v37, 5  ;;  %2981 = vmatprep.mubr.bf16.mxu1 %v2659_v38  ;;  %v514_v48 = vld [vmem:[#allocation2 + $0x18] sm:$0xf]  ;;  %v577_v49 = vrot.slane %v575_v39, 4 }
  0x2d   : > { %v580_v52 = vrot.slane %v578_v41, 5  ;;  %v589_v54 = vshrl.u32 %v514_v48, 16  ;;  %v592_v17 = vshll.u32 %v514_v48, 16  ;;  %v2660_v56 = vcombine.low %v513_v32, %v514_v48  ;;  %v3485_v59 = vld [vmem:[#allocation2 + $0x1c] sm:$0x1]  ;;  %v3204_v38 = vld [vmem:[%s4024_s3 + $0xb0] sm:$0xff]  }
  0x2e   : > { %v567_v60 = vor.u32 %v566_v47, %v563_v46  ;;  %v572_v61 = vrot.slane %v570_v42, 5  ;;  %v598_v62 = vshll.u32 %v3485_v59, 16  ;;  %v586_v4 = vrot.slane %v584_v44, 5  ;;  %v487_v41 = vld [vmem:[#allocation2 + $0x28] sm:$0xf] }
  0x2f   : > { %v591_v0 = vrot.slane %v589_v54, 4  ;;  %v594_v1 = vrot.slane %v592_v17, 5  ;;  %2982 = vmatmul.mubr.bf16.vlgmr.msra.gmra.mxu1 %v2660_v56  ;;  %v581_v3 = vor.u32 %v580_v52, %v577_v49  ;;  %v406_v19 = vor.u32 %v404_v63, %v403_v9  ;;  %v493_v47 = vld [vmem:[#allocation2 + $0x30] sm:$0xf]  ;;  %v490_v48 = vld [vmem:[#allocation2 + $0x2c] sm:$0x1] }
  0x30   : > { %3014 = vmatpush3.bf16.msra.mxu1 %v3411_v43  ;;  %v568_v6 = vrot.slane %v567_v60, 4  ;;  %v600_v7 = vrot.slane %v598_v62, 5  ;;  %v407_v20 = vrot.slane %v403_v9, 4  ;;  %v322_v27 = vmax.f32 %v314_v13, 0.0  ;;  %v499_v17 = vld [vmem:[#allocation2 + $0x38] sm:$0xf] }
  0x31   : > { %3015 = vmatprep.subr.bf16.mxu1 %v3201_v57  ;;  %v582_v10 = vrot.slane %v581_v3, 4  ;;  %v595_v11 = vor.u32 %v594_v1, %v591_v0  ;;  %v409_v29 = vshrl.u32 %v2787_v18, 16  ;;  %v412_v30 = vshll.u32 %v2787_v18, 16  ;;  %v496_v56 = vld [vmem:[#allocation2 + $0x34] sm:$0x1] }
  0x32   : > { %v573_v15 = vsel %vm3457_vm8, %v568_v6, %v572_v61  ;;  %v482_v31 = vsel %vm3420_vm4, %v406_v19, %v481_v5  ;;  %v2788_v32 = vpack.c.bf16 %v321_v14, %v321_v14  ;;  %v2789_v35 = vpack.c.bf16 %v322_v27, %v322_v27  ;;  %v502_v61 = vld [vmem:[#allocation2 + $0x3c] sm:$0x1]  ;;  %v3525_v5 = vld [vmem:[#allocation2] sm:$0xe] }
  0x33   : > { %v2647_v22 = vcombine.low %v559_v34, %v573_v15  ;;  %v587_v43 = vsel %vm3457_vm8, %v582_v10, %v586_v4  ;;  %v596_v23 = vrot.slane %v595_v11, 4  ;;  %483 = vst [vmem:[#allocation2 + $0x20] sm:$0xf] %v482_v31  ;;  %v485_v36 = vsel %vm3431_vm5, %v407_v20, %v484_v21  ;;  %v3535_v11 = vld [vmem:[#allocation2 + $0x8] sm:$0xe]  ;;  %v3211_v27 = vld [vmem:[%s4024_s3 + $0x98] sm:$0xff]  }
  0x34   : > { %3016 = vmatpush3.bf16.msra.mxu1 %v3201_v57  ;;  %v411_v39 = vrot.slane %v409_v29, 7  ;;  %v417_v42 = vshrl.u32 %v2788_v32, 16  ;;  %v420_v44 = vshll.u32 %v2788_v32, 16  ;;  %486 = vst [vmem:[#allocation2 + $0x24] sm:$0x1] %v485_v36  ;;  %v425_v45 = vshrl.u32 %v2789_v35, 16 }
  0x35   : > { %2957 = vmatprep.mubr.bf16.mxu0 %v2647_v22  ;;  %3017 = vmatprep.subr.bf16.mxu1 %v3203_v2  ;;  %v601_v34 = vsel %vm3457_vm8, %v596_v23, %v600_v7  ;;  %v428_v46 = vshll.u32 %v2789_v35, 16  ;;  %v2806_v49 = vunpack.c.h.bf16 %v3463_v26  ;;  %v3207_v57 = vld [vmem:[%s4024_s3 + $0xd8] sm:$0xff]   ;;  %v3206_v26 = vld [vmem:[%s4024_s3 + $0xa8] sm:$0xff]   ;;  %v973_v1 = vrot.slane %v3468_v33, 5  ;;  %v3208_v7 = vld [vmem:[%s4024_s3 + $0xa0] sm:$0xff]  }
  0x36   : > { %v2648_v37 = vcombine.low %v587_v43, %v601_v34  ;;  %v414_v50 = vor.u32 %v412_v30, %v411_v39  ;;  %v415_v52 = vrot.slane %v411_v39, 4  ;;  %v419_v54 = vrot.slane %v417_v42, 7  ;;  %v3546_v23 = vld [vmem:[#allocation2 + $0x10] sm:$0xe]  ;;  %v3212_v29 = vld [vmem:[%s4024_s3 + $0xc8] sm:$0xff]  }
  0x37   : > { %v427_v60 = vrot.slane %v425_v45, 7  ;;  %v300_v6 = vmul.f32 %v2806_v49, %v3372_v12  ;;  %v977_v19 = vrot.slane %v3476_v40, 5  ;;  %v981_v21 = vrot.slane %v3485_v59, 5  ;;  %v3557_v34 = vld [vmem:[#allocation2 + $0x18] sm:$0xe] }
  0x38   : > { %2958 = vmatmul.mubr.bf16.vlgmr.msra.gmra.mxu0 %v2648_v37  ;;  %3018 = vmatpush3.bf16.msra.mxu1 %v3203_v2  ;;  %v488_v62 = vsel %vm3420_vm4, %v414_v50, %v487_v41  ;;  %v422_v63 = vor.u32 %v420_v44, %v419_v54  ;;  %v423_v0 = vrot.slane %v419_v54, 4  ;;  %v3209_v2 = vld [vmem:[%s4024_s3 + $0xd0] sm:$0xff]   ;;  %v2671_v30 = vrot.slane %v3525_v5, 9  ;;  %v3222_v40 = vld [vmem:[%s4024_s3 + $0x138] sm:$0xff]  }
  0x39   : > { %2990 = vmatpush3.bf16.msra.mxu0 %v3427_v55  ;;  %3019 = vmatprep.subr.bf16.mxu1 %v3205_v25  ;;  %v491_v55 = vsel %vm3431_vm5, %v415_v52, %v490_v48  ;;  %489 = vst [vmem:[#allocation2 + $0x28] sm:$0xf] %v488_v62  ;;  %v430_v3 = vor.u32 %v428_v46, %v427_v60  ;;  %v431_v4 = vrot.slane %v427_v60, 4  ;;  %v2672_v31 = vrot.slane %v3535_v11, 9  ;;  %v3214_v48 = vld [vmem:[%s4024_s3 + $0x90] sm:$0xff]   ;;  %v3215_v62 = vld [vmem:[%s4024_s3 + $0xc0] sm:$0xff]  }
  0x3a   : > { %2991 = vmatprep.subr.bf16.mxu0 %v3204_v38  ;;  %492 = vst [vmem:[#allocation2 + $0x2c] sm:$0x1] %v491_v55  ;;  %v515_v8 = vld [vmem:[#allocation2 + $0x20] sm:$0xf]  ;;  %v494_v9 = vsel %vm3420_vm4, %v422_v63, %v493_v47  ;;  %v497_v10 = vsel %vm3431_vm5, %v423_v0, %v496_v56  ;;  %v2673_v37 = vrot.slane %v3546_v23, 9  ;;  %v2674_v63 = vrot.slane %v3557_v34, 9 }
  0x3b   : > { %v603_v13 = vshrl.u32 %v515_v8, 16  ;;  %v606_v14 = vshll.u32 %v515_v8, 16  ;;  %495 = vst [vmem:[#allocation2 + $0x30] sm:$0xf] %v494_v9  ;;  %v500_v12 = vsel %vm3420_vm4, %v430_v3, %v499_v17  ;;  %v3539_v15 = vld [vmem:[#allocation2 + $0x24] sm:$0x1]  ;;  %v503_v18 = vsel %vm3431_vm5, %v431_v4, %v502_v61 }
  0x3c   : > { %3020 = vmatpush3.bf16.msra.mxu1 %v3205_v25  ;;  %498 = vst [vmem:[#allocation2 + $0x34] sm:$0x1] %v497_v10  ;;  %501 = vst [vmem:[#allocation2 + $0x38] sm:$0xf] %v500_v12  ;;  %v612_v20 = vshll.u32 %v3539_v15, 16  ;;  %v315_v25 = vadd.f32 %v3380_v16, %v300_v6  ;;  %v974_v51 = vsel %vm3580_vm11, %v2672_v31, %v973_v1 }
  0x3d   : > { %2992 = vmatpush3.bf16.msra.mxu0 %v3204_v38  ;;  %3021 = vmatprep.subr.bf16.mxu1 %v3207_v57  ;;  %504 = vst [vmem:[#allocation2 + $0x3c] sm:$0x1] %v503_v18  ;;  %v605_v22 = vrot.slane %v603_v13, 4  ;;  %v608_v43 = vrot.slane %v606_v14, 5  ;;  %v3217_v56 = vld [vmem:[#allocation2 + $0x8] ss:$8 sps:$4 sm:$0xff]  }
  0x3e   : > { %2993 = vmatprep.subr.bf16.mxu0 %v3206_v26  ;;  %v614_v36 = vrot.slane %v612_v20, 5  ;;  %v323_v42 = vmax.f32 %v315_v25, 0.0  ;;  %v3574_v4 = vld [vmem:[#allocation2 + $0x20] sm:$0xe]  ;;  %v3216_v18 = vld [vmem:[%s4024_s3 + $0x88] sm:$0xff]  }
  0x3f   : > { %v609_v32 = vor.u32 %v608_v43, %v605_v22  ;;  %v505_v31 = vld [vmem:[#allocation2 + $0x40] sm:$0xf] }
  0x40   : > { %3022 = vmatpush3.bf16.msra.mxu1 %v3207_v57  ;;  %v516_v16 = vld [vmem:[#allocation2 + $0x28] sm:$0xf]  ;;  %v2790_v22 = vpack.c.bf16 %v323_v42, %v323_v42 }
  0x41   : > { %2994 = vmatpush3.bf16.msra.mxu0 %v3206_v26  ;;  %3023 = vmatprep.subr.bf16.mxu1 %v3209_v2  ;;  %v3559_v35 = vld [vmem:[#allocation2 + $0x2c] sm:$0x1]  ;;  %v617_v38 = vshrl.u32 %v516_v16, 16  ;;  %v620_v39 = vshll.u32 %v516_v16, 16  ;;  %v2661_v41 = vcombine.low %v515_v8, %v516_v16  ;;  %v610_v45 = vrot.slane %v609_v32, 4 }
  0x42   : > { %2995 = vmatprep.subr.bf16.mxu0 %v3208_v7  ;;  %v517_v44 = vld [vmem:[#allocation2 + $0x30] sm:$0xf]  ;;  %v626_v46 = vshll.u32 %v3559_v35, 16  ;;  %v945_v20 = vld [vmem:[#allocation2 + $0x28] sm:$0xe]  ;;  %v985_v16 = vrot.slane %v3539_v15, 5 }
  0x43   : > { %v3563_v47 = vld [vmem:[#allocation2 + $0x34] sm:$0x1]  ;;  %v619_v49 = vrot.slane %v617_v38, 4  ;;  %v622_v50 = vrot.slane %v620_v39, 5  ;;  %2985 = vmatprep.mubr.bf16.mxu1 %v2661_v41  ;;  %v518_v52 = vld [vmem:[#allocation2 + $0x38] sm:$0xf]  ;;  %v615_v13 = vsel %vm3457_vm8, %v610_v45, %v614_v36  ;;  %v970_v39 = vsel %vm3580_vm11, %v2671_v30, %v969_v28 }
  0x44   : > { %3024 = vmatpush3.bf16.msra.mxu1 %v3209_v2  ;;  %v631_v54 = vshrl.u32 %v517_v44, 16  ;;  %v634_v17 = vshll.u32 %v517_v44, 16  ;;  %v645_v57 = vshrl.u32 %v518_v52, 16  ;;  %v648_v60 = vshll.u32 %v518_v52, 16  ;;  %v3568_v26 = vld [vmem:[#allocation2 + $0x3c] sm:$0x1] }
  0x45   : > { %2996 = vmatpush3.bf16.msra.mxu0 %v3208_v7  ;;  %3025 = vmatprep.subr.bf16.mxu1 %v3212_v29  ;;  %v2662_v61 = vcombine.low %v517_v44, %v518_v52  ;;  %v623_v2 = vor.u32 %v622_v50, %v619_v49  ;;  %v628_v3 = vrot.slane %v626_v46, 5  ;;  %v640_v8 = vshll.u32 %v3563_v47, 16  ;;  %v3221_v15 = vld [vmem:[%s4024_s3 + $0x170] sm:$0xff]   ;;  %v3220_v28 = vld [vmem:[%s4024_s3 + $0x80] sm:$0xff]   ;;  %v947_v11 = vld [vmem:[#allocation2 + $0x38] sm:$0xe] }
  0x46   : > { %2997 = vmatprep.subr.bf16.mxu0 %v3211_v27  ;;  %v633_v0 = vrot.slane %v631_v54, 4  ;;  %v636_v55 = vrot.slane %v634_v17, 5  ;;  %v647_v6 = vrot.slane %v645_v57, 4  ;;  %v650_v7 = vrot.slane %v648_v60, 5  ;;  %v946_v30 = vld [vmem:[#allocation2 + $0x30] sm:$0xe] }
  0x47   : > { %2986 = vmatmul.mubr.bf16.gmra.mxu1 %v2662_v61  ;;  %v654_v9 = vshll.u32 %v3568_v26, 16  ;;  %v624_v14 = vrot.slane %v623_v2, 4  ;;  %v642_v43 = vrot.slane %v640_v8, 5  ;;  %v2675_v41 = vrot.slane %v3574_v4, 9  ;;  %v3228_v1 = vld [vmem:[#allocation2 + $0x28] ss:$8 sps:$4 sm:$0xff]  }
  0x48   : > { %3026 = vmatpush3.bf16.msra.mxu1 %v3212_v29  ;;  %v637_v12 = vor.u32 %v636_v55, %v633_v0  ;;  %v651_v25 = vor.u32 %v650_v7, %v647_v6  ;;  %v3219_v29 = vld [vmem:[#allocation2 + $0x18] ss:$8 sps:$4 sm:$0xff]   ;;  %3029 = vmatprep.mubr.bf16.mxu1 %v3217_v56  ;;  %v2676_v45 = vrot.slane %v945_v20, 9  ;;  %v433_v46 = vshrl.u32 %v2790_v22, 16  ;;  %v3223_v17 = vld [vmem:[%s4024_s3 + $0x168] sm:$0xff]  }
  0x49   : > { %2998 = vmatpush3.bf16.msra.mxu0 %v3211_v27  ;;  %v656_v32 = vrot.slane %v654_v9, 5  ;;  %3027 = vmatprep.subr.bf16.mxu1 %v3215_v62  ;;  %v3218_v27 = vld [vmem:[%s4024_s3 + $0x178] sm:$0xff]   ;;  %v629_v36 = vsel %vm3457_vm8, %v624_v14, %v628_v3  ;;  %v436_v49 = vshll.u32 %v2790_v22, 16  ;;  %v2679_v52 = vcombine.low %v970_v39, %v974_v51  ;;  %v1322_v61 = vld [vmem:[#allocation2 + $0xc] sm:$0x1] }
  0x4a   : > { %2999 = vmatprep.subr.bf16.mxu0 %v3214_v48  ;;  %v638_v38 = vrot.slane %v637_v12, 4  ;;  %v2649_v42 = vcombine.low %v615_v13, %v629_v36  ;;  %v652_v44 = vrot.slane %v651_v25, 4  ;;  %v3619_v54 = vrot.slane %v433_v46, 7  ;;  %v1602_v0 = vld [vmem:[#allocation2 + $0x8] sm:$0xe]  ;;  %v3227_v25 = vld [vmem:[%s4024_s3 + $0x158] sm:$0xff]  }
  0x4b   : > { %v2677_v56 = vrot.slane %v946_v30, 9  ;;  %v982_v60 = vsel %vm3580_vm11, %v2674_v63, %v981_v21  ;;  %v993_v23 = vrot.slane %v3563_v47, 5  ;;  %v997_v59 = vrot.slane %v3568_v26, 5  ;;  %v3224_v26 = vld [vmem:[%s4024_s3 + $0x130] sm:$0xff]   ;;  %v1321_v13 = vld [vmem:[#allocation2 + $0x8] sm:$0xf] }
  0x4c   : > { %v643_v5 = vsel %vm3457_vm8, %v638_v38, %v642_v43  ;;  %3028 = vmatpush3.bf16.msra.mxu1 %v3215_v62  ;;  %2961 = vmatprep.mubr.bf16.mxu0 %v2649_v42  ;;  %v657_v33 = vsel %vm3457_vm8, %v652_v44, %v656_v32  ;;  %v438_v57 = vor.u32 %v436_v49, %v3619_v54  ;;  %v3637_v62 = vld [vmem:[#allocation2 + $0x14] sm:$0x1]  ;;  %v2715_v55 = vrot.slane %v1602_v0, 9  ;;  %v3226_v14 = vld [vmem:[%s4024_s3 + $0x128] sm:$0xff]   ;;  %v1327_v51 = vld [vmem:[#allocation2 + $0x20] sm:$0xf] }
  0x4d   : > { %3000 = vmatpush3.bf16.msra.mxu0 %v3214_v48  ;;  %v2650_v50 = vcombine.low %v643_v5, %v657_v33  ;;  %3061 = vmatprep.subr.bf16.mxu1 %v3218_v27  ;;  %v989_v48 = vrot.slane %v3559_v35, 5  ;;  %v978_v35 = vsel %vm3580_vm11, %v2673_v37, %v977_v19  ;;  %v2678_v19 = vrot.slane %v947_v11, 9  ;;  %v1603_v37 = vld [vmem:[#allocation2 + $0x10] sm:$0xe]  ;;  %v3230_v5 = vld [vmem:[%s4024_s3 + $0x120] sm:$0xff]  }
  0x4e   : > { %3001 = vmatprep.subr.bf16.mxu0 %v3216_v18  ;;  %v506_v34 = vsel %vm3420_vm4, %v438_v57, %v505_v31  ;;  %v986_v21 = vsel %vm3580_vm11, %v2675_v41, %v985_v16  ;;  %v1628_v2 = vrot.slane %v1322_v61, 5  ;;  %v2680_v3 = vcombine.low %v978_v35, %v982_v60  ;;  %v1325_v16 = vld [vmem:[#allocation2 + $0x18] sm:$0xf]  ;;  %v3677_v30 = vld [vmem:[#allocation2 + $0x24] sm:$0x1] }
  0x4f   : > { %3030 = vmatmul.mubr.bf16.vlgmr.msra.gmra.mxu1 %v3219_v29  ;;  %2962 = vmatmul.mubr.bf16.gmra.mxu0 %v2650_v50  ;;  %v990_v63 = vsel %vm3580_vm11, %v2676_v45, %v989_v48  ;;  %507 = vst [vmem:[#allocation2 + $0x40] sm:$0xf] %v506_v34  ;;  %v2716_v47 = vrot.slane %v1603_v37, 9  ;;  %v1632_v4 = vrot.slane %v3637_v62, 5  ;;  %v994_v7 = vsel %vm3580_vm11, %v2677_v56, %v993_v23  ;;  %v3682_v31 = vld [vmem:[#allocation2 + $0x18] sm:$0xe] }
  0x50   : > { %3062 = vmatpush3.bf16.msra.mxu1 %v3218_v27  ;;  %3005 = vmatprep.mubr.bf16.mxu0 %v2679_v52  ;;  %v2681_v6 = vcombine.low %v986_v21, %v990_v63  ;;  %v998_v8 = vsel %vm3580_vm11, %v2678_v19, %v997_v59  ;;  %v1629_v9 = vsel %vm3580_vm11, %v2715_v55, %v1628_v2  ;;  %v1338_v20 = vshrl.u32 %v1321_v13, 16  ;;  %v1329_v63 = vld [vmem:[#allocation2 + $0x28] sm:$0xf]  ;;  %v3697_v55 = vld [vmem:[#allocation2 + $0x2c] sm:$0x1] }
  0x51   : > { %3002 = vmatpush3.bf16.msra.mxu0 %v3216_v18  ;;  %3063 = vmatprep.subr.bf16.mxu1 %v3221_v15  ;;  %v1633_v12 = vsel %vm3580_vm11, %v2716_v47, %v1632_v4  ;;  %v1323_v18 = vld [vmem:[#allocation2 + $0x10] sm:$0xf]  ;;  %v1341_v22 = vshll.u32 %v1321_v13, 16  ;;  %v1347_v43 = vshll.u32 %v1322_v61, 16  ;;  %v1361_v29 = vshll.u32 %v3637_v62, 16  ;;  %v3233_v61 = vld [vmem:[%s4024_s3 + $0x148] sm:$0xff]  }
  0x52   : > { %3003 = vmatprep.subr.bf16.mxu0 %v3220_v28  ;;  %3033 = vmatprep.mubr.bf16.mxu1 %v3228_v1  ;;  %v1352_v32 = vshrl.u32 %v1323_v18, 16  ;;  %v1355_v27 = vshll.u32 %v1323_v18, 16  ;;  %v2682_v36 = vcombine.low %v994_v7, %v998_v8  ;;  %v1340_v39 = vrot.slane %v1338_v20, 4  ;;  %v3231_v1 = vld [vmem:[%s4024_s3 + $0x150] sm:$0xff]   ;;  %v1605_v62 = vld [vmem:[#allocation2 + $0x20] sm:$0xe] }
  0x53   : > { %v1343_v41 = vrot.slane %v1341_v22, 5  ;;  %v2723_v42 = vcombine.low %v1629_v9, %v1633_v12  ;;  %v1366_v45 = vshrl.u32 %v1325_v16, 16  ;;  %v1349_v49 = vrot.slane %v1347_v43, 5  ;;  %v1331_v47 = vld [vmem:[#allocation2 + $0x30] sm:$0xf]  ;;  %v3235_v43 = vld [vmem:[%s4024_s3 + $0x140] sm:$0xff]  }
  0x54   : > { %3064 = vmatpush3.bf16.msra.mxu1 %v3221_v15  ;;  %v1354_v44 = vrot.slane %v1352_v32, 4  ;;  %v1357_v15 = vrot.slane %v1355_v27, 5  ;;  %v1369_v33 = vshll.u32 %v1325_v16, 16  ;;  %v1380_v11 = vshrl.u32 %v1327_v51, 16  ;;  %v3700_v4 = vld [vmem:[#allocation2 + $0x34] sm:$0x1] }
  0x55   : > { %3004 = vmatpush3.bf16.msra.mxu0 %v3220_v28  ;;  %3065 = vmatprep.subr.bf16.mxu1 %v3223_v17  ;;  %v3675_v28 = vld [vmem:[#allocation2 + $0x1c] sm:$0x1]  ;;  %v1344_v46 = vor.u32 %v1343_v41, %v1340_v39  ;;  %v1363_v52 = vrot.slane %v1361_v29, 5  ;;  %v1368_v48 = vrot.slane %v1366_v45, 4  ;;  %v439_v56 = vrot.slane %v3619_v54, 4  ;;  %v3234_v22 = vld [vmem:[%s4024_s3 + $0x110] sm:$0xff]  }
  0x56   : > { %3037 = vmatprep.subr.bf16.mxu0 %v3222_v40  ;;  %v3229_v38 = vld [vmem:[#allocation2 + $0x38] ss:$8 sps:$4 sm:$0xff]   ;;  %v1358_v50 = vor.u32 %v1357_v15, %v1354_v44  ;;  %v1371_v35 = vrot.slane %v1369_v33, 5  ;;  %v1382_v60 = vrot.slane %v1380_v11, 4  ;;  %v1389_v19 = vshll.u32 %v3677_v30, 16 }
  0x57   : > { %3034 = vmatmul.mubr.bf16.gmra.mxu1 %v3229_v38  ;;  %v1345_v57 = vrot.slane %v1344_v46, 4  ;;  %v3232_v54 = vld [vmem:[%s4024_s3 + $0x118] sm:$0xff]   ;;  %v2717_v2 = vrot.slane %v3682_v31, 9  ;;  %v1397_v7 = vshll.u32 %v1329_v63, 16  ;;  %v1408_v8 = vshrl.u32 %v1331_v47, 16  ;;  %v3236_v31 = vld [vmem:[%s4024_s3 + $0x108] sm:$0xff]  }
  0x58   : > { %3006 = vmatmul.mubr.bf16.vlgmr.msra.gmra.mxu0 %v2680_v3  ;;  %3066 = vmatpush3.bf16.msra.mxu1 %v3223_v17  ;;  %v1383_v17 = vshll.u32 %v1327_v51, 16  ;;  %v1359_v0 = vrot.slane %v1358_v50, 4  ;;  %v1372_v37 = vor.u32 %v1371_v35, %v1368_v48  ;;  %v508_v9 = vld [vmem:[#allocation2 + $0x44] sm:$0x1]  ;;  %v2718_v13 = vrot.slane %v1605_v62, 9  ;;  %v3237_v41 = vld [vmem:[%s4024_s3 + $0x1f8] sm:$0xff]  }
  0x59   : > { %3038 = vmatpush3.bf16.msra.mxu0 %v3222_v40  ;;  %3067 = vmatprep.subr.bf16.mxu1 %v3225_v53  ;;  %v1375_v40 = vshll.u32 %v3675_v28, 16  ;;  %v1350_v59 = vsel %vm3457_vm8, %v1345_v57, %v1349_v49  ;;  %v3706_v12 = vrot.slane %v1389_v19, 5  ;;  %v1411_v18 = vshll.u32 %v1331_v47, 16  ;;  %v1333_v20 = vld [vmem:[#allocation2 + $0x38] sm:$0xf]  ;;  %v3239_v35 = vld [vmem:[%s4024_s3 + $0x1f0] sm:$0xff]  }
  0x5a   : > { %3039 = vmatprep.subr.bf16.mxu0 %v3224_v26  ;;  %3009 = vmatprep.mubr.bf16.mxu0 %v2681_v6  ;;  %v1385_v23 = vrot.slane %v1383_v17, 5  ;;  %v1364_v34 = vsel %vm3457_vm8, %v1359_v0, %v1363_v52  ;;  %v1640_v6 = vrot.slane %v3677_v30, 5  ;;  %v1403_v27 = vshll.u32 %v3697_v55, 16  ;;  %v1335_v39 = vld [vmem:[#allocation2 + $0x40] sm:$0xf] }
  0x5b   : > { %3077 = vmatprep.mubr.bf16.mxu1 %v2723_v42  ;;  %v2703_v3 = vcombine.low %v1350_v59, %v1364_v34  ;;  %v1417_v29 = vshll.u32 %v3700_v4, 16  ;;  %v509_v38 = vsel %vm3431_vm5, %v439_v56, %v508_v9  ;;  %v1410_v42 = vrot.slane %v1408_v8, 4  ;;  %v1607_v17 = vld [vmem:[#allocation2 + $0x30] sm:$0xe]  ;;  %v1608_v0 = vld [vmem:[#allocation2 + $0x38] sm:$0xe] }
  0x5c   : > { %3068 = vmatpush3.bf16.msra.mxu1 %v3225_v53  ;;  %v1386_v21 = vor.u32 %v1385_v23, %v1382_v60  ;;  %v1394_v53 = vshrl.u32 %v1329_v63, 16  ;;  %v1413_v44 = vrot.slane %v1411_v18, 5  ;;  %510 = vst [vmem:[#allocation2 + $0x44] sm:$0x1] %v509_v38  ;;  %v1422_v15 = vshrl.u32 %v1333_v20, 16  ;;  %v3238_v23 = vld [vmem:[%s4024_s3 + $0x100] sm:$0xff]  }
  0x5d   : > { %3040 = vmatpush3.bf16.msra.mxu0 %v3224_v26  ;;  %3069 = vmatprep.subr.bf16.mxu1 %v3227_v25  ;;  %v1636_v26 = vrot.slane %v3675_v28, 5  ;;  %v1425_v51 = vshll.u32 %v1333_v20, 16  ;;  %v1334_v28 = vld [vmem:[#allocation2 + $0x3c] sm:$0x1]  ;;  %v1436_v58 = vshrl.u32 %v1335_v39, 16  ;;  %v1439_v30 = vshll.u32 %v1335_v39, 16 }
  0x5e   : > { %3041 = vmatprep.subr.bf16.mxu0 %v3226_v14  ;;  %v3716_v32 = vrot.slane %v1386_v21, 4  ;;  %v1396_v16 = vrot.slane %v1394_v53, 4  ;;  %v3729_v46 = vrot.slane %v1403_v27, 5  ;;  %v3731_v49 = vrot.slane %v1417_v29, 5  ;;  %v1983_v39 = vld [vmem:[#allocation2 + $0x18] sm:$0xf] }
  0x5f   : > { %v1637_v45 = vsel %vm3580_vm11, %v2717_v2, %v1636_v26  ;;  %v1424_v33 = vrot.slane %v1422_v15, 4  ;;  %v1427_v11 = vrot.slane %v1425_v51, 5  ;;  %v1438_v52 = vrot.slane %v1436_v58, 4 }
  0x60   : > { %3010 = vmatmul.mubr.bf16.gmra.mxu0 %v2682_v36  ;;  %3070 = vmatpush3.bf16.msra.mxu1 %v3227_v25  ;;  %v3714_v25 = vrot.slane %v1372_v37, 4  ;;  %v1399_v36 = vrot.slane %v1397_v7, 5  ;;  %v1441_v48 = vrot.slane %v1439_v30, 5  ;;  %v1414_v60 = vor.u32 %v1413_v44, %v1410_v42  ;;  %v3241_v7 = vld [vmem:[%s4024_s3 + $0x1e8] sm:$0xff]  }
  0x61   : > { %3042 = vmatpush3.bf16.msra.mxu0 %v3226_v14  ;;  %3071 = vmatprep.subr.bf16.mxu1 %v3231_v1  ;;  %v3704_v14 = vrot.slane %v1375_v40, 5  ;;  %v2720_v62 = vrot.slane %v1607_v17, 9  ;;  %v1609_v40 = vld [vmem:[#allocation2 + $0x40] sm:$0xe]  ;;  %v1648_v19 = vrot.slane %v3700_v4, 5  ;;  %v1428_v59 = vor.u32 %v1427_v11, %v1424_v33 }
  0x62   : > { %3043 = vmatprep.subr.bf16.mxu0 %v3230_v5  ;;  %3053 = vmatprep.mubr.bf16.mxu0 %v2703_v3  ;;  %v1400_v50 = vor.u32 %v1399_v36, %v1396_v16  ;;  %v1431_v34 = vshll.u32 %v1334_v28, 16  ;;  %v1652_v21 = vrot.slane %v1334_v28, 5  ;;  %v2722_v3 = vrot.slane %v1609_v40, 9  ;;  %v1981_v16 = vld [vmem:[#allocation2 + $0x10] sm:$0xf] }
  0x63   : > { %v1649_v2 = vsel %vm3580_vm11, %v2720_v62, %v1648_v19  ;;  %v1415_v47 = vrot.slane %v1414_v60, 4  ;;  %v1442_v53 = vor.u32 %v1441_v48, %v1438_v52  ;;  %v1392_v18 = vsel %vm3457_vm8, %v3716_v32, %v3706_v12  ;;  %v3775_v36 = vld [vmem:[#allocation2 + $0x14] sm:$0x1]  ;;  %v3789_v17 = vld [vmem:[#allocation2 + $0x24] sm:$0x1] }
  0x64   : > { %3072 = vmatpush3.bf16.msra.mxu1 %v3231_v1  ;;  %v1606_v1 = vld [vmem:[#allocation2 + $0x28] sm:$0xe]  ;;  %v1401_v63 = vrot.slane %v1400_v50, 4  ;;  %v1429_v20 = vrot.slane %v1428_v59, 4  ;;  %v1998_v42 = vshrl.u32 %v1981_v16, 16  ;;  %v2001_v44 = vshll.u32 %v1981_v16, 16 }
  0x65   : > { %3044 = vmatpush3.bf16.msra.mxu0 %v3230_v5  ;;  %3073 = vmatprep.subr.bf16.mxu1 %v3233_v61  ;;  %v1641_v5 = vsel %vm3580_vm11, %v2718_v13, %v1640_v6  ;;  %v2719_v56 = vrot.slane %v1606_v1, 9  ;;  %v3240_v6 = vld [vmem:[%s4024_s3 + $0x1b8] sm:$0xff]   ;;  %v1378_v13 = vsel %vm3457_vm8, %v3714_v25, %v3704_v14  ;;  %v3243_v14 = vld [vmem:[%s4024_s3 + $0x1e0] sm:$0xff]   ;;  %v1420_v25 = vsel %vm3457_vm8, %v1415_v47, %v3731_v49  ;;  %v3242_v28 = vld [vmem:[%s4024_s3 + $0x1b0] sm:$0xff]  }
  0x66   : > { %3045 = vmatprep.subr.bf16.mxu0 %v3232_v54  ;;  %v2724_v57 = vcombine.low %v1637_v45, %v1641_v5  ;;  %v1443_v12 = vrot.slane %v1442_v53, 4  ;;  %v2704_v38 = vcombine.low %v1378_v13, %v1392_v18  ;;  %v2007_v15 = vshll.u32 %v3775_v36, 16  ;;  %v3245_v49 = vld [vmem:[%s4024_s3 + $0x1d8] sm:$0xff]   ;;  %v1985_v1 = vld [vmem:[#allocation2 + $0x20] sm:$0xf]  ;;  %v3249_v13 = vld [vmem:[%s4024_s3 + $0x1c8] sm:$0xff]  }
  0x67   : > { %v2012_v51 = vshrl.u32 %v1983_v39, 16  ;;  %v2015_v45 = vshll.u32 %v1983_v39, 16  ;;  %v2000_v30 = vrot.slane %v1998_v42, 4  ;;  %v3793_v60 = vld [vmem:[#allocation2 + $0x2c] sm:$0x1]  ;;  %v2029_v62 = vshll.u32 %v1985_v1, 16 }
  0x68   : > { %3074 = vmatpush3.bf16.msra.mxu1 %v3233_v61  ;;  %v1644_v61 = vrot.slane %v3697_v55, 5  ;;  %v1336_v55 = vld [vmem:[#allocation2 + $0x44] sm:$0x1]  ;;  %v2009_v52 = vrot.slane %v2007_v15, 5  ;;  %v2035_v47 = vshll.u32 %v3789_v17, 16  ;;  %v2049_v53 = vshll.u32 %v3793_v60, 16 }
  0x69   : > { %3046 = vmatpush3.bf16.msra.mxu0 %v3232_v54  ;;  %3075 = vmatprep.subr.bf16.mxu1 %v3235_v43  ;;  %v2721_v54 = vrot.slane %v1608_v0, 9  ;;  %v1445_v4 = vshll.u32 %v1336_v55, 16  ;;  %v1656_v9 = vrot.slane %v1336_v55, 5  ;;  %v2014_v33 = vrot.slane %v2012_v51, 4  ;;  %v3244_v0 = vld [vmem:[%s4024_s3 + $0x1a8] sm:$0xff]  }
  0x6a   : > { %3047 = vmatprep.subr.bf16.mxu0 %v3234_v22  ;;  %v1645_v37 = vsel %vm3580_vm11, %v2719_v56, %v1644_v61  ;;  %v2017_v11 = vrot.slane %v2015_v45, 5  ;;  %v1987_v56 = vld [vmem:[#allocation2 + $0x28] sm:$0xf]  ;;  %v2026_v61 = vshrl.u32 %v1985_v1, 16  ;;  %v2037_v18 = vrot.slane %v2035_v47, 5 }
  0x6b   : > { %v2725_v26 = vcombine.low %v1645_v37, %v1649_v2  ;;  %v1653_v8 = vsel %vm3580_vm11, %v2721_v54, %v1652_v21  ;;  %v1657_v27 = vsel %vm3580_vm11, %v2722_v3, %v1656_v9  ;;  %v1447_v32 = vrot.slane %v1445_v4, 5  ;;  %v3247_v21 = vld [vmem:[%s4024_s3 + $0x1d0] sm:$0xff]   ;;  %v3246_v4 = vld [vmem:[%s4024_s3 + $0x1a0] sm:$0xff]   ;;  %v3248_v9 = vld [vmem:[%s4024_s3 + $0x198] sm:$0xff]  }
  0x6c   : > { %3076 = vmatpush3.bf16.msra.mxu1 %v3235_v43  ;;  %v1406_v43 = vsel %vm3457_vm8, %v1401_v63, %v3729_v46  ;;  %v2726_v29 = vcombine.low %v1653_v8, %v1657_v27  ;;  %v2003_v46 = vrot.slane %v2001_v44, 5  ;;  %v2043_v19 = vshll.u32 %v1987_v56, 16  ;;  %v3256_v8 = vld [vmem:[#allocation2 + $0x10] ss:$8 sps:$4 sm:$0xff]   ;;  %v3251_v27 = vld [vmem:[%s4024_s3 + $0x1c0] sm:$0xff]  }
  0x6d   : > { %3048 = vmatpush3.bf16.msra.mxu0 %v3234_v22  ;;  %3109 = vmatprep.subr.bf16.mxu1 %v3237_v41  ;;  %v1433_v22 = vrot.slane %v1431_v34, 5  ;;  %v2705_v58 = vcombine.low %v1406_v43, %v1420_v25  ;;  %v2028_v59 = vrot.slane %v2026_v61, 4  ;;  %v2031_v34 = vrot.slane %v2029_v62, 5  ;;  %v3250_v25 = vld [vmem:[%s4024_s3 + $0x190] sm:$0xff]   ;;  %v1993_v44 = vld [vmem:[#allocation2 + $0x40] sm:$0xf] }
  0x6e   : > { %3049 = vmatprep.subr.bf16.mxu0 %v3236_v31  ;;  %v2004_v50 = vor.u32 %v2003_v46, %v2000_v30  ;;  %v2045_v2 = vrot.slane %v2043_v19, 5  ;;  %v3252_v62 = vld [vmem:[%s4024_s3 + $0x188] sm:$0xff]  }
  0x6f   : > { %3078 = vmatmul.mubr.bf16.vlgmr.msra.gmra.mxu1 %v2724_v57  ;;  %v1448_v57 = vsel %vm3457_vm8, %v1443_v12, %v1447_v32  ;;  %v3822_v12 = vld [vmem:[#allocation2 + $0x34] sm:$0x1]  ;;  %v1991_v32 = vld [vmem:[#allocation2 + $0x38] sm:$0xf] }
  0x70   : > { %3110 = vmatpush3.bf16.msra.mxu1 %v3237_v41  ;;  %3081 = vmatprep.mubr.bf16.mxu1 %v2725_v26  ;;  %v3777_v41 = vld [vmem:[#allocation2 + $0x1c] sm:$0x1]  ;;  %v2005_v40 = vrot.slane %v2004_v50, 4  ;;  %v2063_v39 = vshll.u32 %v3822_v12, 16  ;;  %v2068_v42 = vshrl.u32 %v1991_v32, 16  ;;  %v2071_v45 = vshll.u32 %v1991_v32, 16 }
  0x71   : > { %3050 = vmatpush3.bf16.msra.mxu0 %v3236_v31  ;;  %3111 = vmatprep.subr.bf16.mxu1 %v3239_v35  ;;  %v2021_v5 = vshll.u32 %v3777_v41, 16  ;;  %v1434_v31 = vsel %vm3457_vm8, %v1429_v20, %v1433_v22  ;;  %v2051_v20 = vrot.slane %v2049_v53, 5  ;;  %v2082_v50 = vshrl.u32 %v1993_v44, 16  ;;  %v2262_v32 = vld [vmem:[#allocation2 + $0x10] sm:$0xe] }
  0x72   : > { %3051 = vmatprep.subr.bf16.mxu0 %v3238_v23  ;;  %v2706_v37 = vcombine.low %v1434_v31, %v1448_v57  ;;  %v2010_v63 = vsel %vm3457_vm8, %v2005_v40, %v2009_v52  ;;  %v2073_v1 = vrot.slane %v2071_v45, 5  ;;  %v2085_v52 = vshll.u32 %v1993_v44, 16 }
  0x73   : > { %v2023_v48 = vrot.slane %v2021_v5, 5  ;;  %v2084_v40 = vrot.slane %v2082_v50, 4  ;;  %v2759_v44 = vrot.slane %v2262_v32, 9 }
  0x74   : > { %3112 = vmatpush3.bf16.msra.mxu1 %v3239_v35  ;;  %v2018_v35 = vor.u32 %v2017_v11, %v2014_v33  ;;  %v2070_v33 = vrot.slane %v2068_v42, 4  ;;  %v3834_v11 = vld [vmem:[#allocation2 + $0x4c] sm:$0x1]  ;;  %v3260_v42 = vld [vmem:[#allocation2 + $0x30] ss:$8 sps:$4 sm:$0xff]  }
  0x75   : > { %3052 = vmatpush3.bf16.msra.mxu0 %v3238_v23  ;;  %3113 = vmatprep.subr.bf16.mxu1 %v3241_v7  ;;  %v2040_v23 = vshrl.u32 %v1987_v56, 16  ;;  %v2105_v19 = vshll.u32 %v3834_v11, 16 }
  0x76   : > { %3085 = vmatprep.subr.bf16.mxu0 %v3240_v6  ;;  %v2019_v54 = vrot.slane %v2018_v35, 4 }
  0x77   : > { %3082 = vmatmul.mubr.bf16.gmra.mxu1 %v2726_v29  ;;  %v2042_v55 = vrot.slane %v2040_v23, 4  ;;  %v3824_v29 = vld [vmem:[#allocation2 + $0x3c] sm:$0x1]  ;;  %v2087_v23 = vrot.slane %v2085_v52, 5  ;;  %v2107_v53 = vrot.slane %v2105_v19, 5  ;;  %v2316_v52 = vrot.slane %v3834_v11, 5 }
  0x78   : > { %3054 = vmatmul.mubr.bf16.vlgmr.msra.gmra.mxu0 %v2704_v38  ;;  %3114 = vmatpush3.bf16.msra.mxu1 %v3241_v7  ;;  %v2024_v3 = vsel %vm3457_vm8, %v2019_v54, %v2023_v48  ;;  %v2077_v5 = vshll.u32 %v3824_v29, 16  ;;  %v3839_v48 = vld [vmem:[%s4024_s3 + $0x238] sm:$0xff]   ;;  %v2265_v11 = vld [vmem:[#allocation2 + $0x28] sm:$0xe]  ;;  %v2300_v19 = vrot.slane %v3793_v60, 5 }
  0x79   : > { %3086 = vmatpush3.bf16.msra.mxu0 %v3240_v6  ;;  %3115 = vmatprep.subr.bf16.mxu1 %v3243_v14  ;;  %v2747_v26 = vcombine.low %v2010_v63, %v2024_v3  ;;  %v2032_v6 = vor.u32 %v2031_v34, %v2028_v59  ;;  %v2046_v7 = vor.u32 %v2045_v2, %v2042_v55  ;;  %v3255_v2 = vld [vmem:[%s4024_s3 + $0x230] sm:$0xff]  }
  0x7a   : > { %3087 = vmatprep.subr.bf16.mxu0 %v3242_v28  ;;  %3057 = vmatprep.mubr.bf16.mxu0 %v2705_v58  ;;  %v1995_v58 = vld [vmem:[#allocation2 + $0x48] sm:$0xf]  ;;  %v2079_v31 = vrot.slane %v2077_v5, 5  ;;  %v2088_v63 = vor.u32 %v2087_v23, %v2084_v40  ;;  %v2292_v5 = vrot.slane %v3777_v41, 5  ;;  %v2296_v40 = vrot.slane %v3789_v17, 5 }
  0x7b   : > { %3125 = vmatprep.mubr.bf16.mxu1 %v2747_v26  ;;  %v2033_v22 = vrot.slane %v2032_v6, 4  ;;  %v2047_v43 = vrot.slane %v2046_v7, 4  ;;  %v2096_v35 = vshrl.u32 %v1995_v58, 16  ;;  %v2099_v61 = vshll.u32 %v1995_v58, 16  ;;  %v3254_v26 = vld [vmem:[%s4024_s3 + $0x180] sm:$0xff]   ;;  %v3262_v58 = vld [vmem:[%s4024_s3 + $0x218] sm:$0xff]  }
  0x7c   : > { %3116 = vmatpush3.bf16.msra.mxu1 %v3243_v14  ;;  %v1989_v14 = vld [vmem:[#allocation2 + $0x30] sm:$0xf]  ;;  %v2089_v7 = vrot.slane %v2088_v63, 4  ;;  %v3261_v41 = vld [vmem:[#allocation2 + $0x40] ss:$8 sps:$4 sm:$0xff]   ;;  %v2762_v23 = vrot.slane %v2265_v11, 9 }
  0x7d   : > { %3088 = vmatpush3.bf16.msra.mxu0 %v3242_v28  ;;  %3117 = vmatprep.subr.bf16.mxu1 %v3245_v49  ;;  %v2054_v16 = vshrl.u32 %v1989_v14, 16  ;;  %v2057_v38 = vshll.u32 %v1989_v14, 16  ;;  %v2038_v15 = vsel %vm3457_vm8, %v2033_v22, %v2037_v18  ;;  %v2052_v51 = vsel %vm3457_vm8, %v2047_v43, %v2051_v20  ;;  %v3832_v28 = vld [vmem:[#allocation2 + $0x44] sm:$0x1]  ;;  %v3258_v14 = vld [vmem:[%s4024_s3 + $0x228] sm:$0xff]  }
  0x7e   : > { %3089 = vmatprep.subr.bf16.mxu0 %v3244_v0  ;;  %v2091_v57 = vshll.u32 %v3832_v28, 16  ;;  %v2748_v54 = vcombine.low %v2038_v15, %v2052_v51  ;;  %v2098_v34 = vrot.slane %v2096_v35, 4  ;;  %v2304_v18 = vrot.slane %v3822_v12, 5 }
  0x7f   : > { %v2056_v30 = vrot.slane %v2054_v16, 4  ;;  %v2059_v46 = vrot.slane %v2057_v38, 5  ;;  %v3257_v16 = vld [vmem:[#allocation2 + $0x20] ss:$8 sps:$4 sm:$0xff]   ;;  %v2288_v51 = vrot.slane %v3775_v36, 5  ;;  %v2312_v50 = vrot.slane %v3832_v28, 5 }
  0x80   : > { %3058 = vmatmul.mubr.bf16.gmra.mxu0 %v2706_v37  ;;  %3118 = vmatpush3.bf16.msra.mxu1 %v3245_v49  ;;  %v2065_v49 = vrot.slane %v2063_v39, 5  ;;  %v2101_v37 = vrot.slane %v2099_v61, 5  ;;  %v2093_v55 = vrot.slane %v2091_v57, 5  ;;  %v2263_v39 = vld [vmem:[#allocation2 + $0x18] sm:$0xe]  ;;  %v3265_v57 = vld [vmem:[%s4024_s3 + $0x200] sm:$0xff]  }
  0x81   : > { %3090 = vmatpush3.bf16.msra.mxu0 %v3244_v0  ;;  %3119 = vmatprep.subr.bf16.mxu1 %v3247_v21  ;;  %v2060_v56 = vor.u32 %v2059_v46, %v2056_v30  ;;  %v2074_v0 = vor.u32 %v2073_v1, %v2070_v33  ;;  %v2760_v45 = vrot.slane %v2263_v39, 9  ;;  %v2289_v30 = vsel %vm3580_vm11, %v2759_v44, %v2288_v51  ;;  %v3263_v46 = vld [vmem:[%s4024_s3 + $0x210] sm:$0xff]   ;;  %v3264_v33 = vld [vmem:[%s4024_s3 + $0x208] sm:$0xff]   ;;  %v2268_v1 = vld [vmem:[#allocation2 + $0x40] sm:$0xe] }
  0x82   : > { %3091 = vmatprep.subr.bf16.mxu0 %v3246_v4  ;;  %3101 = vmatprep.mubr.bf16.mxu0 %v3256_v8  ;;  %v2102_v47 = vor.u32 %v2101_v37, %v2098_v34  ;;  %v2267_v8 = vld [vmem:[#allocation2 + $0x38] sm:$0xe]  ;;  %v2094_v20 = vsel %vm3457_vm8, %v2089_v7, %v2093_v55  ;;  %v2264_v28 = vld [vmem:[#allocation2 + $0x20] sm:$0xe] }
  0x83   : > { %v2061_v59 = vrot.slane %v2060_v56, 4  ;;  %v2764_v43 = vrot.slane %v2267_v8, 9  ;;  %v2293_v36 = vsel %vm3580_vm11, %v2760_v45, %v2292_v5 }
  0x84   : > { %3120 = vmatpush3.bf16.msra.mxu1 %v3247_v21  ;;  %v2075_v21 = vrot.slane %v2074_v0, 4  ;;  %v2761_v0 = vrot.slane %v2264_v28, 9 }
  0x85   : > { %3092 = vmatpush3.bf16.msra.mxu0 %v3246_v4  ;;  %3121 = vmatprep.subr.bf16.mxu1 %v3249_v13  ;;  %v2066_v3 = vsel %vm3457_vm8, %v2061_v59, %v2065_v49  ;;  %v2266_v4 = vld [vmem:[#allocation2 + $0x30] sm:$0xe]  ;;  %v2767_v49 = vcombine.low %v2289_v30, %v2293_v36  ;;  %v2301_v59 = vsel %vm3580_vm11, %v2762_v23, %v2300_v19 }
  0x86   : > { %3093 = vmatprep.subr.bf16.mxu0 %v3248_v9  ;;  %v2080_v6 = vsel %vm3457_vm8, %v2075_v21, %v2079_v31  ;;  %v2763_v22 = vrot.slane %v2266_v4, 9  ;;  %v2269_v31 = vld [vmem:[#allocation2 + $0x48] sm:$0xe] }
  0x87   : > { %v2766_v56 = vrot.slane %v2269_v31, 9 }
  0x88   : > { %3122 = vmatpush3.bf16.msra.mxu1 %v3249_v13  ;;  %v2103_v13 = vrot.slane %v2102_v47, 4  ;;  %v2305_v38 = vsel %vm3580_vm11, %v2763_v22, %v2304_v18 }
  0x89   : > { %3094 = vmatpush3.bf16.msra.mxu0 %v3248_v9  ;;  %3123 = vmatprep.subr.bf16.mxu1 %v3251_v27  ;;  %v2749_v9 = vcombine.low %v2066_v3, %v2080_v6  ;;  %v2317_v61 = vsel %vm3580_vm11, %v2766_v56, %v2316_v52 }
  0x8a   : > { %3095 = vmatprep.subr.bf16.mxu0 %v3250_v25 }
  0x8c   : > { %3124 = vmatpush3.bf16.msra.mxu1 %v3251_v27  ;;  %v2308_v27 = vrot.slane %v3824_v29, 5 }
  0x8d   : > { %3096 = vmatpush3.bf16.msra.mxu0 %v3250_v25  ;;  %3157 = vmatprep.subr.bf16.mxu1 %v3839_v48  ;;  %v2108_v25 = vsel %vm3457_vm8, %v2103_v13, %v2107_v53 }
  0x8e   : > { %3097 = vmatprep.subr.bf16.mxu0 %v3252_v62  ;;  %v2750_v12 = vcombine.low %v2094_v20, %v2108_v25  ;;  %v2309_v29 = vsel %vm3580_vm11, %v2764_v43, %v2308_v27 }
  0x8f   : > { %3126 = vmatmul.mubr.bf16.vlgmr.msra.gmra.mxu1 %v2748_v54  ;;  %v2769_v15 = vcombine.low %v2305_v38, %v2309_v29  ;;  %v2297_v54 = vsel %vm3580_vm11, %v2761_v0, %v2296_v40 }
  0x90   : > { %3165 = vmatpush3.bf16.msra.mxu1 %v3839_v48  ;;  %3129 = vmatprep.mubr.bf16.mxu1 %v2749_v9  ;;  %v2768_v34 = vcombine.low %v2297_v54, %v2301_v59 }
  0x91   : > { %3098 = vmatpush3.bf16.msra.mxu0 %v3252_v62  ;;  %3158 = vmatprep.subr.bf16.mxu1 %v3255_v2 }
  0x92   : > { %3099 = vmatprep.subr.bf16.mxu0 %v3254_v26 }
  0x94   : > { %3166 = vmatpush3.bf16.msra.mxu1 %v3255_v2 }
  0x95   : > { %3100 = vmatpush3.bf16.msra.mxu0 %v3254_v26  ;;  %3159 = vmatprep.subr.bf16.mxu1 %v3258_v14 }
  0x96   : > { %3133 = vmatprep.subr.bf16.mxu0 %v3839_v48 }
  0x97   : > { %3130 = vmatmul.mubr.bf16.gmra.mxu1 %v2750_v12 }
  0x98   : > { %3102 = vmatmul.mubr.bf16.vlgmr.msra.gmra.mxu0 %v3257_v16  ;;  %3167 = vmatpush3.bf16.msra.mxu1 %v3258_v14 }
  0x99   : > { %3134 = vmatpush3.bf16.msra.mxu0 %v3839_v48  ;;  %3160 = vmatprep.subr.bf16.mxu1 %v3259_v24  ;;  %v2765_v48 = vrot.slane %v2268_v1, 9 }
  0x9a   : > { %3135 = vmatprep.subr.bf16.mxu0 %v3255_v2  ;;  %3105 = vmatprep.mubr.bf16.mxu0 %v3260_v42 }
  0x9b   : > { %3153 = vmatprep.mubr.bf16.mxu1 %v2769_v15  ;;  %v2313_v35 = vsel %vm3580_vm11, %v2765_v48, %v2312_v50 }
  0x9c   : > { %3168 = vmatpush3.bf16.msra.mxu1 %v3259_v24  ;;  %v2770_v62 = vcombine.low %v2313_v35, %v2317_v61 }
  0x9d   : > { %3136 = vmatpush3.bf16.msra.mxu0 %v3255_v2  ;;  %3161 = vmatprep.subr.bf16.mxu1 %v3262_v58 }
  0x9e   : > { %3137 = vmatprep.subr.bf16.mxu0 %v3258_v14 }
  0xa0   : > { %3106 = vmatmul.mubr.bf16.gmra.mxu0 %v3261_v41  ;;  %3169 = vmatpush3.bf16.msra.mxu1 %v3262_v58 }
  0xa1   : > { %3138 = vmatpush3.bf16.msra.mxu0 %v3258_v14  ;;  %3162 = vmatprep.subr.bf16.mxu1 %v3263_v46 }
  0xa2   : > { %3139 = vmatprep.subr.bf16.mxu0 %v3259_v24  ;;  %3149 = vmatprep.mubr.bf16.mxu0 %v2767_v49 }
  0xa4   : > { %3170 = vmatpush3.bf16.msra.mxu1 %v3263_v46 }
  0xa5   : > { %3140 = vmatpush3.bf16.msra.mxu0 %v3259_v24  ;;  %3163 = vmatprep.subr.bf16.mxu1 %v3264_v33 }
  0xa6   : > { %3141 = vmatprep.subr.bf16.mxu0 %v3262_v58 }
  0xa8   : > { %3171 = vmatpush3.bf16.msra.mxu1 %v3264_v33 }
  0xa9   : > { %3142 = vmatpush3.bf16.msra.mxu0 %v3262_v58  ;;  %3164 = vmatprep.subr.bf16.mxu1 %v3265_v57 }
  0xaa   : > { %3143 = vmatprep.subr.bf16.mxu0 %v3263_v46 }
  0xac   : > { %3172 = vmatpush3.bf16.msra.mxu1 %v3265_v57 }
  0xad   : > { %3144 = vmatpush3.bf16.msra.mxu0 %v3263_v46 }
  0xae   : > { %3145 = vmatprep.subr.bf16.mxu0 %v3264_v33 }
  0xaf   : > { %3154 = vmatmul.mubr.bf16.vlgmr.msra.gmra.mxu1 %v2770_v62 }
  0xb1   : > { %3146 = vmatpush3.bf16.msra.mxu0 %v3264_v33 }
  0xb2   : > { %3147 = vmatprep.subr.bf16.mxu0 %v3265_v57 }
  0xb5   : > { %3148 = vmatpush3.bf16.msra.mxu0 %v3265_v57 }
  0xb8   : > { %3150 = vmatmul.mubr.bf16.vlgmr.msra.gmra.mxu0 %v2768_v34 }
  0xef   : > { %v3906_v37 = vpop.f32.mrf.mxu1 }
  0xf1   : > { %v3908_v21 = vpop.f32.mrf.mxu1 }
  0xf3   : > { %v3910_v17 = vpop.f32.mrf.mxu1 }
  0xf5   : > { %v3914_v63 = vpop.f32.mrf.mxu1 }
  0xf8   : > { %v3912_v60 = vpop.f32.mrf.mxu0 }
  0xfa   : > { %v3916_v55 = vpop.f32.mrf.mxu0 }
  0xfc   : > { %v3918_v3 = vpop.f32.mrf.mxu0 }
  0xfe   : > { %v3920_v47 = vpop.f32.mrf.mxu0 }
 0x107   : > { %v2987_v2 = vpop.f32.mrf.mxu1 }
 0x109   : > { %v925_v10 = vpop.f32.mrf.mxu1 }
 0x10b   : > { %v2988_v53 = vpop.f32.mrf.mxu1 }
 0x10d   : > { %v928_v6 = vpop.f32.mrf.mxu1 }
 0x10f   : > { %v2963_v4 = vpop.f32.mrf.mxu0  ;;  %v3922_v7 = vpop.f32.mrf.mxu1 }
 0x110   : > { %v934_v62 = vadd.f32 %v2987_v2, %v2963_v4  ;;  %v918_v2 = vadd.f32 %v3906_v37, %v3912_v60 }
 0x111   : > { %v788_v26 = vpop.f32.mrf.mxu0  ;;  %v3924_v9 = vpop.f32.mrf.mxu1 }
 0x112   : > { %v926_v19 = vadd.f32 %v925_v10, %v788_v26  ;;  %v921_v10 = vadd.f32 %v3910_v17, %v3918_v3 }
 0x113   : > { %v2964_v8 = vpop.f32.mrf.mxu0  ;;  %v3928_v20 = vpop.f32.mrf.mxu1 }
 0x114   : > { %v937_v0 = vadd.f32 %v2988_v53, %v2964_v8  ;;  %v910_v53 = vadd.f32 %v3908_v21, %v3916_v55 }
 0x115   : > { %v791_v13 = vpop.f32.mrf.mxu0  ;;  %v3932_v43 = vpop.f32.mrf.mxu1 }
 0x116   : > { %v929_v54 = vadd.f32 %v928_v6, %v791_v13  ;;  %v913_v13 = vadd.f32 %v3914_v63, %v3920_v47 }
 0x117   : > { %v3035_v14 = vpop.f32.mrf.mxu1 }
 0x118   : > { %v3926_v18 = vpop.f32.mrf.mxu0 }
 0x119   : > { %v1298_v12 = vpop.f32.mrf.mxu1 }
 0x11a   : > { %v3930_v22 = vpop.f32.mrf.mxu0 }
 0x11b   : > { %v3036_v16 = vpop.f32.mrf.mxu1 }
 0x11c   : > { %v3008_v27 = vpop.f32.mrf.mxu0 }
 0x11d   : > { %v1301_v29 = vpop.f32.mrf.mxu1 }
 0x11e   : > { %v3934_v25 = vpop.f32.mrf.mxu0 }
 0x11f   : > { %v1145_v60 = vadd.f32 %v3934_v25, %v913_v13 }
 0x120   : > { %v3011_v32 = vpop.f32.mrf.mxu0 }
 0x121   : > { %v1150_v59 = vadd.f32 %v3011_v32, %v934_v62  ;;  %v1147_v32 = vadd.f32 %v3008_v27, %v921_v10  ;;  %v1314_v27 = vadd.f32 %v3932_v43, %v1145_v60 }
 0x122   : > { %v1129_v38 = vpop.f32.mrf.mxu0 }
 0x123   : > { %v1316_v63 = vadd.f32 %v3928_v20, %v1147_v32 }
 0x124   : > { %v3012_v24 = vpop.f32.mrf.mxu0 }
 0x125   : > { %v1151_v34 = vadd.f32 %v3012_v24, %v937_v0 }
 0x126   : > { %v1132_v44 = vpop.f32.mrf.mxu0 }
 0x12f   : > { %v3936_v39 = vpop.f32.mrf.mxu1 }
 0x131   : > { %v3938_v42 = vpop.f32.mrf.mxu1 }
 0x132   : > { %4037 = vst [vmem:[#allocation3_spill] sm:$0xff] %v3938_v42 }
 0x133   : > { %v3942_v51 = vpop.f32.mrf.mxu1 }
 0x134   : > { %4038 = vst [vmem:[#allocation4_spill] sm:$0xff] %v3942_v51 }
 0x135   : > { %v3946_v5 = vpop.f32.mrf.mxu1 }
 0x136   : > { %4039 = vst [vmem:[#allocation5_spill] sm:$0xff] %v3946_v5  ;;  %v1319_v5 = vadd.f32 %v3035_v14, %v1150_v59  ;;  %v1146_v14 = vadd.f32 %v3926_v18, %v918_v2 }
 0x137   : > { %v3083_v30 = vpop.f32.mrf.mxu1 }
 0x138   : > { %v3940_v15 = vpop.f32.mrf.mxu0  ;;  %v1315_v24 = vadd.f32 %v3922_v7, %v1146_v14 }
 0x139   : > { %v1788_v41 = vpop.f32.mrf.mxu1  ;;  %v4047_v43 = vld [vmem:[#allocation3_spill] sm:$0xff] }
 0x13a   : > { %v3944_v45 = vpop.f32.mrf.mxu0  ;;  %v1596_v25 = vadd.f32 %v3940_v15, %v1315_v24 }
 0x13b   : > { %v3084_v49 = vpop.f32.mrf.mxu1 }
 0x13c   : > { %v3948_v58 = vpop.f32.mrf.mxu0 }
 0x13d   : > { %v1791_v1 = vpop.f32.mrf.mxu1 }
 0x13e   : > { %v3950_v36 = vpop.f32.mrf.mxu0 }
 0x13f   : > { %v1595_v7 = vadd.f32 %v3950_v36, %v1314_v27 }
 0x140   : > { %v3059_v46 = vpop.f32.mrf.mxu0 }
 0x141   : > { %v1600_v42 = vadd.f32 %v3059_v46, %v1319_v5 }
 0x142   : > { %v1579_v33 = vpop.f32.mrf.mxu0 }
 0x144   : > { %v3060_v50 = vpop.f32.mrf.mxu0 }
 0x146   : > { %v1582_v48 = vpop.f32.mrf.mxu0 }
 0x14f   : > { %v3952_v31 = vpop.f32.mrf.mxu1 }
 0x150   : > { %4040 = vst [vmem:[#allocation6_spill] sm:$0xff] %v3952_v31  ;;  %v1149_v31 = vadd.f32 %v1132_v44, %v929_v54 }
 0x151   : > { %v3954_v52 = vpop.f32.mrf.mxu1 }
 0x152   : > { %4041 = vst [vmem:[#allocation7_spill] sm:$0xff] %v3954_v52  ;;  %v1148_v52 = vadd.f32 %v1129_v38, %v926_v19 }
 0x153   : > { %v3958_v57 = vpop.f32.mrf.mxu1 }
 0x154   : > { %4043 = vst [vmem:[#allocation9_spill] sm:$0xff] %v3958_v57  ;;  %v1317_v51 = vadd.f32 %v1298_v12, %v1148_v52  ;;  %v1144_v12 = vadd.f32 %v3930_v22, %v910_v53 }
 0x155   : > { %v3964_v28 = vpop.f32.mrf.mxu1 }
 0x156   : > { %4046 = vst [vmem:[#allocation12_spill] sm:$0xff] %v3964_v28  ;;  %v1598_v6 = vadd.f32 %v1579_v33, %v1317_v51  ;;  %v1313_v44 = vadd.f32 %v3924_v9, %v1144_v12  ;;  %v1597_v51 = vadd.f32 %v3948_v58, %v1316_v63 }
 0x157   : > { %v3131_v23 = vpop.f32.mrf.mxu1  ;;  %v4053_v54 = vld [vmem:[#allocation6_spill] sm:$0xff] }
 0x158   : > { %v3956_v56 = vpop.f32.mrf.mxu0  ;;  %v1807_v38 = vadd.f32 %v1788_v41, %v1598_v6 }
 0x159   : > { %4042 = vst [vmem:[#allocation8_spill] sm:$0xff] %v3956_v56  ;;  %v2239_v57 = vpop.f32.mrf.mxu1 }
 0x15a   : > { %v3960_v35 = vpop.f32.mrf.mxu0 }
 0x15b   : > { %4044 = vst [vmem:[#allocation10_spill] sm:$0xff] %v3960_v35  ;;  %v1320_v35 = vadd.f32 %v3036_v16, %v1151_v34  ;;  %v3132_v26 = vpop.f32.mrf.mxu1  ;;  %v1809_v16 = vadd.f32 %v3083_v30, %v1600_v42  ;;  %v1594_v42 = vadd.f32 %v3944_v45, %v1313_v44  ;;  %v4054_v34 = vld [vmem:[#allocation7_spill] sm:$0xff]  ;;  %v4055_v53 = vld [vmem:[#allocation9_spill] sm:$0xff] }
 0x15c   : > { %v3962_v61 = vpop.f32.mrf.mxu0 }
 0x15d   : > { %4045 = vst [vmem:[#allocation11_spill] sm:$0xff] %v3962_v61  ;;  %v1318_v61 = vadd.f32 %v1301_v29, %v1149_v31  ;;  %v1601_v28 = vadd.f32 %v3060_v50, %v1320_v35  ;;  %v2242_v55 = vpop.f32.mrf.mxu1  ;;  %v1803_v31 = vadd.f32 %v4047_v43, %v1594_v42  ;;  %v4048_v50 = vld [vmem:[#allocation4_spill] sm:$0xff] }
 0x15e   : > { %v3966_v11 = vpop.f32.mrf.mxu0  ;;  %v1806_v15 = vadd.f32 %v4048_v50, %v1597_v51 }
 0x15f   : > { %v1599_v8 = vadd.f32 %v1582_v48, %v1318_v61  ;;  %v1810_v37 = vadd.f32 %v3084_v49, %v1601_v28  ;;  %v4049_v48 = vld [vmem:[#allocation5_spill] sm:$0xff] }
 0x160   : > { %v3107_v40 = vpop.f32.mrf.mxu0 }
 0x161   : > { %v1808_v17 = vadd.f32 %v1791_v1, %v1599_v8  ;;  %v1979_v3 = vadd.f32 %v3107_v40, %v1809_v16  ;;  %v1805_v1 = vadd.f32 %v3936_v39, %v1596_v25 }
 0x162   : > { %v1958_v56 = vpop.f32.mrf.mxu0  ;;  %v4051_v35 = vld [vmem:[#allocation10_spill] sm:$0xff] }
 0x163   : > { %v1977_v18 = vadd.f32 %v1958_v56, %v1807_v38  ;;  %v2260_v30 = vadd.f32 %v3131_v23, %v1979_v3  ;;  %v1804_v56 = vadd.f32 %v4049_v48, %v1595_v7  ;;  %v1973_v61 = vadd.f32 %v4051_v35, %v1803_v31 }
 0x164   : > { %v3108_v4 = vpop.f32.mrf.mxu0  ;;  %v4052_v28 = vld [vmem:[#allocation11_spill] sm:$0xff] }
 0x165   : > { %v1980_v29 = vadd.f32 %v3108_v4, %v1810_v37  ;;  %v2258_v46 = vadd.f32 %v2239_v57, %v1977_v18  ;;  %v4050_v57 = vld [vmem:[#allocation8_spill] sm:$0xff]  ;;  %v1976_v62 = vadd.f32 %v4052_v28, %v1806_v15  ;;  %v1974_v23 = vadd.f32 %v3966_v11, %v1804_v56 }
 0x166   : > { %v1961_v21 = vpop.f32.mrf.mxu0  ;;  %v1975_v39 = vadd.f32 %v4050_v57, %v1805_v1  ;;  %v2254_v2 = vadd.f32 %v4054_v34, %v1973_v61 }
 0x167   : > { %v1978_v22 = vadd.f32 %v1961_v21, %v1808_v17  ;;  %v2261_v41 = vadd.f32 %v3132_v26, %v1980_v29  ;;  %v2257_v10 = vadd.f32 %v4055_v53, %v1976_v62  ;;  %v4056_v26 = vld [vmem:[#allocation12_spill] sm:$0xff] }
 0x168   : > { %v2256_v59 = vadd.f32 %v4053_v54, %v1975_v39  ;;  %v2255_v6 = vadd.f32 %v4056_v26, %v1974_v23 }
 0x169   : > { %v2259_v20 = vadd.f32 %v2242_v55, %v1978_v22 }
 0x16f   : > { %v3155_v47 = vpop.f32.mrf.mxu1 }
 0x170   : > { %v2469_v49 = vadd.f32 %v3155_v47, %v2260_v30 }
 0x171   : > { %v2448_v5 = vpop.f32.mrf.mxu1 }
 0x172   : > { %v2467_v58 = vadd.f32 %v2448_v5, %v2258_v46  ;;  %v2507_v25 = vmul.f32 %v2469_v49, %v2469_v49 }
 0x173   : > { %v3156_v9 = vpop.f32.mrf.mxu1 }
 0x174   : > { %v2470_v33 = vadd.f32 %v3156_v9, %v2261_v41  ;;  %v2505_v44 = vmul.f32 %v2467_v58, %v2467_v58 }
 0x175   : > { %v2451_v45 = vpop.f32.mrf.mxu1 }
 0x176   : > { %v2825_v36 = vpack.c.bf16 %v2470_v33, %v2469_v49  ;;  %v2468_v52 = vadd.f32 %v2451_v45, %v2259_v20  ;;  %v2508_v5 = vmul.f32 %v2470_v33, %v2470_v33 }
 0x178   : > { %2832 = vst [vmem:[%s3995_s30 + $0x18] sm:$0xff] %v2825_v36   ;;  %v2820_v0 = vpack.c.bf16 %v2468_v52, %v2467_v58  ;;  %v3151_v40 = vpop.f32.mrf.mxu0  ;;  %v2506_v18 = vmul.f32 %v2468_v52, %v2468_v52 }
 0x179   : > { %v2465_v8 = vadd.f32 %v3151_v40, %v2256_v59 }
 0x17a   : > { %2831 = vst [vmem:[%s3995_s30 + $0x10] sm:$0xff] %v2820_v0   ;;  %v2432_v19 = vpop.f32.mrf.mxu0 }
 0x17b   : > { %v2463_v13 = vadd.f32 %v2432_v19, %v2254_v2  ;;  %v2503_v55 = vmul.f32 %v2465_v8, %v2465_v8 }
 0x17c   : > { %v3152_v4 = vpop.f32.mrf.mxu0 }
 0x17d   : > { %v2466_v14 = vadd.f32 %v3152_v4, %v2257_v10  ;;  %v2501_v37 = vmul.f32 %v2463_v13, %v2463_v13 }
 0x17e   : > { %v2435_v12 = vpop.f32.mrf.mxu0 }
 0x17f   : > { %v2815_v32 = vpack.c.bf16 %v2466_v14, %v2465_v8  ;;  %v2464_v16 = vadd.f32 %v2435_v12, %v2255_v6  ;;  %v2504_v3 = vmul.f32 %v2466_v14, %v2466_v14 }
 0x181   : > { %2830 = vst [vmem:[%s3995_s30 + $0x8] sm:$0xff] %v2815_v32   ;;  %v2810_v11 = vpack.c.bf16 %v2464_v16, %v2463_v13  ;;  %v2487_v60 = vadd.f32 %v2464_v16, %v2463_v13  ;;  %v2502_v21 = vmul.f32 %v2464_v16, %v2464_v16 }
 0x183   : > { %2811 = vst [vmem:[%s3995_s30] sm:$0xff] %v2810_v11   ;;  %v2488_v38 = vadd.f32 %v2487_v60, %v2465_v8  ;;  %v2509_v17 = vadd.f32 %v2502_v21, %v2501_v37 }
 0x185   : > { %v2489_v29 = vadd.f32 %v2488_v38, %v2466_v14  ;;  %v2510_v24 = vadd.f32 %v2509_v17, %v2503_v55 }
 0x187   : > { %v2490_v63 = vadd.f32 %v2489_v29, %v2467_v58  ;;  %v2511_v47 = vadd.f32 %v2510_v24, %v2504_v3 }
 0x189   : > { %v2491_v22 = vadd.f32 %v2490_v63, %v2468_v52  ;;  %v2512_v27 = vadd.f32 %v2511_v47, %v2505_v44 }
 0x18b   : > { %v2492_v42 = vadd.f32 %v2491_v22, %v2469_v49  ;;  %v2513_v51 = vadd.f32 %v2512_v27, %v2506_v18 }
 0x18d   : > { %v2493_v30 = vadd.f32 %v2492_v42, %v2470_v33  ;;  %v2514_v41 = vadd.f32 %v2513_v51, %v2507_v25 }
 0x18f   : > { %v2494_v7 = vrot.slane %v2493_v30, 4  ;;  %v2515_v9 = vadd.f32 %v2514_v41, %v2508_v5 }
 0x191   : > { %v2495_v46 = vadd.f32 %v2494_v7, %v2493_v30  ;;  %v2516_v20 = vrot.slane %v2515_v9, 4 }
 0x193   : > { %v2496_v1 = vrot.slane %v2495_v46, 2  ;;  %v2517_v43 = vadd.f32 %v2516_v20, %v2515_v9 }
 0x195   : > { %v2497_v31 = vadd.f32 %v2496_v1, %v2495_v46  ;;  %v2518_v50 = vrot.slane %v2517_v43, 2 }
 0x197   : > { %v2498_v15 = vrot.slane %v2497_v31, 1  ;;  %v2519_v45 = vadd.f32 %v2518_v50, %v2517_v43 }
 0x199   : > { %v2499_v49 = vadd.f32 %v2498_v15, %v2497_v31  ;;  %v2520_v58 = vrot.slane %v2519_v45, 1 }
 0x19b   : > { %2500 = vst [vmem:[%s265_s8] sm:$0x1] %v2499_v49  ;;  %v2521_v33 = vadd.f32 %v2520_v58, %v2519_v45 }
 0x19d   : > { %2522 = vst [vmem:[%s268_s11] sm:$0x1] %v2521_v33 }
 0x19e PF: > { %s17_s21 = sadd.s32 1, %s3272_s21  }
 0x19f   : > { %p14_p4 = scmp.ge.s32.totalorder %s17_s21, 4  }
 0x1a1   :  { %16 = sbr.rel (!%p14_p4) target bundleno = 1 (0x1), region = 92 }

</bundles_post_ra>
